<compile_context>
chip_gen: v5e
topology: v5e:2x2
jax: 0.10.0
libtpu: 0.0.40
codegen_flags: <defaults>
</compile_context>

<pallas_src>
import functools
import math

import jax
import jax.numpy as jnp
from jax.experimental import pallas as pl
from jax.experimental.pallas import tpu as pltpu


# ----------------------------------------------------------------------------
# Fused per-layer Pallas kernel
# ----------------------------------------------------------------------------
def _interp_layer_kernel(pcd_ref, k_ref, w1p_ref, w1f_ref, b1_ref, w2_ref,
                         b2_ref, w3_ref, cb3_ref, w4_ref, b4_ref,
                         pcd_out_ref, k_out_ref, *, up, scale):
    """One lane-tile of an Interpolation layer (all `up` replicas per step).

    pcd_ref     : (3, T)  f32   current point coordinates
    k_ref       : (C, T)  bf16  current point features
    weights     : VMEM-resident (constant index maps); matmul weights in bf16
    pcd_out_ref : (3, up*T) f32  replica r occupies lanes [r*T, (r+1)*T)
    k_out_ref   : (C, up*T) bf16 idem
    """
    T = k_ref.shape[1]
    wdt = w2_ref.dtype

    x_p = pcd_ref[...]                                    # (3, T) f32
    x_k = k_ref[...]                                      # (C, T) bf16

    # pcd contribution: contraction depth 3 -> do it on the VPU, not the MXU.
    w1p = w1p_ref[...]                                    # (C, 3) f32
    h = (w1p[:, 0:1] * x_p[0:1, :]
         + w1p[:, 1:2] * x_p[1:2, :]
         + w1p[:, 2:3] * x_p[2:3, :])                     # (C, T) f32

    # bf16 x bf16 MXU matmuls with f32 accumulation.
    h = h + jnp.dot(w1f_ref[...], x_k, preferred_element_type=jnp.float32)
    h = jnp.maximum(h + b1_ref[...], 0.0).astype(wdt)
    h = jnp.dot(w2_ref[...], h, preferred_element_type=jnp.float32)
    h = jnp.maximum(h + b2_ref[...], 0.0).astype(wdt)
    # shared replica head; per-replica code + b3 folded into cb3 = w3@code + b3
    y3 = jnp.dot(w3_ref[...], h, preferred_element_type=jnp.float32)    # (C,T)

    cb3 = cb3_ref[...]                                    # (C, up) f32
    for r in range(up):                                   # static unroll
        child = jnp.maximum(y3 + cb3[:, r:r + 1], 0.0).astype(k_out_ref.dtype)
        k_out_ref[:, r * T:(r + 1) * T] = child           # dense 128-aligned store

    # one batched W4 matmul over all replicas, streamed back out of VMEM
    children = k_out_ref[...]                             # (C, up*T) bf16
    off = jnp.tanh(jnp.dot(w4_ref[...], children,
                           preferred_element_type=jnp.float32) + b4_ref[...])
    x_rep = x_p if up == 1 else jnp.concatenate([x_p] * up, axis=1)
    pcd_out_ref[...] = (x_rep + off * scale).astype(pcd_out_ref.dtype)


def _lane_tile(m, c, up, cap=1024, vmem_budget=20 * 1024 * 1024):
    """Largest lane tile T (multiple of 128, divides m, <= cap) whose
    double-buffered input+output blocks fit the VMEM budget."""
    assert m % 128 == 0, "point axis must be padded to a multiple of 128"
    k = m // 128
    best = 128
    for d in range(1, k + 1):
        if k % d:
            continue
        t = 128 * d
        if t > cap:
            break
        blk = 2 * (t * (2 * c + 12) + up * t * (2 * c + 12))   # in + out, x2 buffers
        if blk <= vmem_budget:
            best = t
    return best


def interpolation_layer(params, pcd_int, k_int, up, scale, *, tile_cap=1024):
    """pcd_int: (3, M) f32, k_int: (C, M) bf16 -> ((3, up*M), (C, up*M), fact, cons)."""
    _, M = pcd_int.shape
    C = k_int.shape[0]
    T = _lane_tile(M, C, up, cap=tile_cap)
    n_tiles = M // T
    bf = jnp.bfloat16

    # fold the learned per-replica code + b3 through w3 (exact, in f32)
    cb3 = (params["w3"] @ params["code"] + params["b3"][:, None]).astype(jnp.float32)

    const = lambda i: (0, 0)
    in_specs = [
        pl.BlockSpec((3, T), lambda i: (0, i)),            # pcd tile
        pl.BlockSpec((C, T), lambda i: (0, i)),            # K tile
        pl.BlockSpec((C, 3), const),                       # w1p (f32, VPU path)
        pl.BlockSpec((C, C), const),                       # w1f (bf16)
        pl.BlockSpec((C, 1), const),                       # b1
        pl.BlockSpec((C, C), const),                       # w2  (bf16)
        pl.BlockSpec((C, 1), const),                       # b2
        pl.BlockSpec((C, C), const),                       # w3  (bf16)
        pl.BlockSpec((C, up), const),                      # cb3
        pl.BlockSpec((3, C), const),                       # w4  (bf16)
        pl.BlockSpec((3, 1), const),                       # b4
    ]
    out_specs = (
        pl.BlockSpec((3, up * T), lambda i: (0, i)),       # pcd_new
        pl.BlockSpec((C, up * T), lambda i: (0, i)),       # K_new
    )
    out_shape = (
        jax.ShapeDtypeStruct((3, up * M), jnp.float32),
        jax.ShapeDtypeStruct((C, up * M), k_int.dtype),
    )

    feat_bytes = jnp.dtype(k_int.dtype).itemsize
    cost = pl.CostEstimate(
        flops=int(2 * M * 3 * C * C + 6 * M * C
                  + 2 * up * M * 3 * C + 6 * up * M * C),
        transcendentals=int(3 * up * M),
        bytes_accessed=int(M * (12 + C * feat_bytes)
                           + up * M * (12 + C * feat_bytes)
                           + (3 * C * C + 6 * C + C * up + 3 * C + 3) * 4),
    )

    pcd_new, k_new = pl.pallas_call(
        functools.partial(_interp_layer_kernel, up=up, scale=float(scale)),
        out_shape=out_shape,
        grid=(n_tiles,),
        in_specs=in_specs,
        out_specs=out_specs,
        compiler_params=pltpu.CompilerParams(
            dimension_semantics=("parallel",),
            vmem_limit_bytes=32 * 1024 * 1024),
        cost_estimate=cost,
    )(pcd_int, k_int,
      params["w1p"].astype(jnp.float32),
      params["w1f"].astype(bf),
      params["b1"].astype(jnp.float32)[:, None],
      params["w2"].astype(bf),
      params["b2"].astype(jnp.float32)[:, None],
      params["w3"].astype(bf),
      cb3,
      params["w4"].astype(bf),
      params["b4"].astype(jnp.float32)[:, None])

    cons = None   # TODO(synk): constraint head of Interpolation unavailable
    return pcd_new, k_new, (n_tiles, up, T), cons


# ----------------------------------------------------------------------------
# Internal (tile-blocked) layout -> canonical interleaved point ordering
# ----------------------------------------------------------------------------
def _internal_to_canonical_pcd(pcd_int, facts, B, N0):
    """(3, M) internal layout -> (B, N0*U, 3) canonical ordering.

    Layer l writes replica r of input point (i*T + t) at lane index
    i*(u*T) + r*T + t.  Peel that factorisation layer by layer (newest
    first), pushing each replica axis to its canonical trailing position.
    Only the 3-channel pcd array is ever permuted; the feature chain stays
    in its internal layout.
    """
    x = pcd_int[:, :, None]                                # (3, M_L, 1)
    for (n, u, T) in reversed(facts):
        tr = x.shape[-1]
        x = x.reshape(3, n, u, T, tr)
        x = jnp.transpose(x, (0, 1, 3, 2, 4))              # (3, n, T, u, tr)
        x = x.reshape(3, n * T, u * tr)                    # middle = prev layer index
    U = x.shape[-1]
    x = x[:, : B * N0, :]                                  # drop lane padding
    x = x.reshape(3, B, N0, U)
    return jnp.transpose(x, (1, 2, 3, 0)).reshape(B, N0 * U, 3)


# ----------------------------------------------------------------------------
# UPProcess forward (mirrors the PyTorch module)
# ----------------------------------------------------------------------------
def upprocess_forward(params_list, seed, fea, glo_fea, upscale, scale,
                      feat_dtype=jnp.bfloat16):
    """seed: (B, N0, 3), fea: (B, C, N0), glo_fea: (B, C, 1) (unused, as in ref)."""
    del glo_fea                      # reference forward never passes it to layers
    B, N0, _ = seed.shape
    C = fea.shape[1]
    M0 = B * N0
    M_pad = max(128, ((M0 + 127) // 128) * 128)

    # one-time NCW -> channels-major (C, B*N0) internal layout, padded to 128 lanes
    pcd_int = jnp.transpose(seed, (2, 0, 1)).reshape(3, M0).astype(jnp.float32)
    k_int = jnp.transpose(fea, (1, 0, 2)).reshape(C, M0).astype(feat_dtype)
    if M_pad != M0:
        pcd_int = jnp.pad(pcd_int, ((0, 0), (0, M_pad - M0)))
        k_int = jnp.pad(k_int, ((0, 0), (0, M_pad - M0)))

    pred_pcds = [seed]
    constrain = []
    facts = []
    for params, up, sc in zip(params_list, upscale, scale):
        pcd_int, k_int, fact, cons = interpolation_layer(params, pcd_int, k_int, up, sc)
        facts.append(fact)
        pred_pcds.append(
            _internal_to_canonical_pcd(pcd_int, facts, B, N0).astype(seed.dtype))
        if cons is not None:
            constrain.append(cons)
    pred_pcds.append(jnp.concatenate(constrain, axis=-1) if constrain else None)
    return pred_pcds


# ----------------------------------------------------------------------------
# Deterministic parameter init
# ----------------------------------------------------------------------------
def make_upprocess_params(key, embed_dim, upscale):
    params_list = []
    for up in upscale:
        key, k1, k2, k3, k4, k5 = jax.random.split(key, 6)

        def lin(k, cout, cin):
            s = 1.0 / math.sqrt(cin)
            return jax.random.uniform(k, (cout, cin), jnp.float32, -s, s)

        w1 = lin(k1, embed_dim, embed_dim + 3)
        params_list.append(dict(
            w1p=w1[:, :3],
            w1f=w1[:, 3:],
            b1=jnp.zeros((embed_dim,), jnp.float32),
            w2=lin(k2, embed_dim, embed_dim),
            b2=jnp.zeros((embed_dim,), jnp.float32),
            code=0.1 * jax.random.normal(k3, (embed_dim, up), jnp.float32),
            w3=lin(k4, embed_dim, embed_dim),
            b3=jnp.zeros((embed_dim,), jnp.float32),
            w4=lin(k5, 3, embed_dim),
            b4=jnp.zeros((3,), jnp.float32),
        ))
    return params_list


# ----------------------------------------------------------------------------
# Pure-JAX reference of the same layer math (canonical interleaved ordering)
# ----------------------------------------------------------------------------
def _reference_forward(params_list, seed, fea, upscale, scale,
                       feat_dtype=jnp.bfloat16):
    pcd = jnp.transpose(seed, (0, 2, 1)).astype(jnp.float32)        # (B, 3, N)
    K = fea.astype(feat_dtype)
    preds = [seed]
    for params, up, sc in zip(params_list, upscale, scale):
        x = jnp.concatenate([pcd, K.astype(jnp.float32)], axis=1)
        w1 = jnp.concatenate([params["w1p"], params["w1f"]], axis=1)
        h = jax.nn.relu(jnp.einsum("oi,bin->bon", w1, x)
                        + params["b1"][None, :, None])
        h = jax.nn.relu(jnp.einsum("oi,bin->bon", params["w2"], h)
                        + params["b2"][None, :, None])
        h_dup = jnp.repeat(h, up, axis=-1)
        code = jnp.tile(params["code"], (1, h.shape[-1]))[None]
        child = jax.nn.relu(jnp.einsum("oi,bin->bon", params["w3"], h_dup + code)
                            + params["b3"][None, :, None])
        off = jnp.tanh(jnp.einsum("oi,bin->bon", params["w4"], child)
                       + params["b4"][None, :, None]) * sc
        pcd = jnp.repeat(pcd, up, axis=-1) + off
        K = child.astype(feat_dtype)
        preds.append(jnp.transpose(pcd, (0, 2, 1)))
    preds.append(None)
    return preds


if __name__ == "__main__":
    B, N0, embed_dim = 2, 8, 32
    upscale = [1, 2, 8]
    scale = [0.4, 0.3, 0.2]

    key = jax.random.PRNGKey(0)
    ks, kf, kg = jax.random.split(key, 3)
    seed_pcd = jax.random.normal(ks, (B, N0, 3), jnp.float32)       # (b, n, 3)
    fea = jax.random.normal(kf, (B, embed_dim, N0), jnp.float32)    # (b, C, n)
    glo_fea = jax.random.normal(kg, (B, embed_dim, 1), jnp.float32)

    params_list = make_upprocess_params(jax.random.PRNGKey(42), embed_dim, upscale)

    fwd = jax.jit(lambda p, s, f, g: upprocess_forward(p, s, f, g, upscale, scale))
    outs = fwd(params_list, seed_pcd, fea, glo_fea)
    for o in outs:
        if o is not None:
            jax.block_until_ready(o)

    # sanity on shapes implied by the upscale factors
    assert outs[0].shape == (B, N0, 3)
    assert outs[1].shape == (B, N0 * 1, 3)
    assert outs[2].shape == (B, N0 * 1 * 2, 3)
    assert outs[3].shape == (B, N0 * 1 * 2 * 8, 3)
    assert outs[4] is None

    # numerical check against the pure-JAX (f32-weight) reference of the same
    # layer math; tolerance covers the bf16 MXU path adopted per the review.
    refs = _reference_forward(params_list, seed_pcd, fea, upscale, scale)
    for got, want in zip(outs[1:4], refs[1:4]):
        abs_err = jnp.abs(got - want)
        max_err = float(jnp.max(abs_err))
        mean_err = float(jnp.mean(abs_err))
        assert max_err < 1e-1, f"mismatch vs reference: max abs err {max_err}"
        assert mean_err < 2e-2, f"mismatch vs reference: mean abs err {mean_err}"

    print("KERNEL_OK")
</pallas_src>

<mosaic_0001>
module attributes {stable_mosaic.version = 11 : i64} {
  func.func @_interp_layer_kernel(%arg0: i32, %arg1: memref<3x128xf32, #tpu.memory_space<vmem>>, %arg2: memref<32x128xbf16, #tpu.memory_space<vmem>>, %arg3: memref<32x3xf32, #tpu.memory_space<vmem>>, %arg4: memref<32x32xbf16, #tpu.memory_space<vmem>>, %arg5: memref<32x1xf32, #tpu.memory_space<vmem>>, %arg6: memref<32x32xbf16, #tpu.memory_space<vmem>>, %arg7: memref<32x1xf32, #tpu.memory_space<vmem>>, %arg8: memref<32x32xbf16, #tpu.memory_space<vmem>>, %arg9: memref<32x1xf32, #tpu.memory_space<vmem>>, %arg10: memref<3x32xbf16, #tpu.memory_space<vmem>>, %arg11: memref<3x1xf32, #tpu.memory_space<vmem>>, %arg12: memref<3x128xf32, #tpu.memory_space<vmem>>, %arg13: memref<32x128xbf16, #tpu.memory_space<vmem>>) attributes {dimension_semantics = [#tpu.dimension_semantics<parallel>], iteration_bounds = array<i64: 1>, scalar_prefetch = 0 : i64, scratch_operands = 0 : i64, tpu.core_type = #tpu.core_type<tc>, window_params = [{transform_indices = @transform_0, window_bounds = array<i64: 3, 128>}, {transform_indices = @transform_1, window_bounds = array<i64: 32, 128>}, {pipeline_mode = #tpu.pipeline_mode<synchronous>, transform_indices = @transform_2, window_bounds = array<i64: 32, 3>}, {pipeline_mode = #tpu.pipeline_mode<synchronous>, transform_indices = @transform_3, window_bounds = array<i64: 32, 32>}, {pipeline_mode = #tpu.pipeline_mode<synchronous>, transform_indices = @transform_4, window_bounds = array<i64: 32, 1>}, {pipeline_mode = #tpu.pipeline_mode<synchronous>, transform_indices = @transform_5, window_bounds = array<i64: 32, 32>}, {pipeline_mode = #tpu.pipeline_mode<synchronous>, transform_indices = @transform_6, window_bounds = array<i64: 32, 1>}, {pipeline_mode = #tpu.pipeline_mode<synchronous>, transform_indices = @transform_7, window_bounds = array<i64: 32, 32>}, {pipeline_mode = #tpu.pipeline_mode<synchronous>, transform_indices = @transform_8, window_bounds = array<i64: 32, 1>}, {pipeline_mode = #tpu.pipeline_mode<synchronous>, transform_indices = @transform_9, window_bounds = array<i64: 3, 32>}, {pipeline_mode = #tpu.pipeline_mode<synchronous>, transform_indices = @transform_10, window_bounds = array<i64: 3, 1>}, {transform_indices = @transform_11, window_bounds = array<i64: 3, 128>}, {transform_indices = @transform_12, window_bounds = array<i64: 32, 128>}]} {
    %c0 = arith.constant 0 : index
    %c0_0 = arith.constant 0 : index
    %0 = vector.load %arg1[%c0, %c0_0] : memref<3x128xf32, #tpu.memory_space<vmem>>, vector<3x128xf32>
    %c0_1 = arith.constant 0 : index
    %c0_2 = arith.constant 0 : index
    %1 = vector.load %arg2[%c0_1, %c0_2] : memref<32x128xbf16, #tpu.memory_space<vmem>>, vector<32x128xbf16>
    %c0_3 = arith.constant 0 : index
    %c0_4 = arith.constant 0 : index
    %2 = vector.load %arg3[%c0_3, %c0_4] : memref<32x3xf32, #tpu.memory_space<vmem>>, vector<32x3xf32>
    %3 = vector.extract_strided_slice %2 {offsets = [0, 0], sizes = [32, 1], strides = [1, 1]} : vector<32x3xf32> to vector<32x1xf32>
    %4 = vector.extract_strided_slice %0 {offsets = [0, 0], sizes = [1, 128], strides = [1, 1]} : vector<3x128xf32> to vector<1x128xf32>
    %5 = vector.broadcast %3 : vector<32x1xf32> to vector<32x128xf32>
    %6 = vector.broadcast %4 : vector<1x128xf32> to vector<32x128xf32>
    %7 = arith.mulf %5, %6 : vector<32x128xf32>
    %8 = vector.extract_strided_slice %2 {offsets = [0, 1], sizes = [32, 1], strides = [1, 1]} : vector<32x3xf32> to vector<32x1xf32>
    %9 = vector.extract_strided_slice %0 {offsets = [1, 0], sizes = [1, 128], strides = [1, 1]} : vector<3x128xf32> to vector<1x128xf32>
    %10 = vector.broadcast %8 : vector<32x1xf32> to vector<32x128xf32>
    %11 = vector.broadcast %9 : vector<1x128xf32> to vector<32x128xf32>
    %12 = arith.mulf %10, %11 : vector<32x128xf32>
    %13 = arith.addf %7, %12 : vector<32x128xf32>
    %14 = vector.extract_strided_slice %2 {offsets = [0, 2], sizes = [32, 1], strides = [1, 1]} : vector<32x3xf32> to vector<32x1xf32>
    %15 = vector.extract_strided_slice %0 {offsets = [2, 0], sizes = [1, 128], strides = [1, 1]} : vector<3x128xf32> to vector<1x128xf32>
    %16 = vector.broadcast %14 : vector<32x1xf32> to vector<32x128xf32>
    %17 = vector.broadcast %15 : vector<1x128xf32> to vector<32x128xf32>
    %18 = arith.mulf %16, %17 : vector<32x128xf32>
    %19 = arith.addf %13, %18 : vector<32x128xf32>
    %c0_5 = arith.constant 0 : index
    %c0_6 = arith.constant 0 : index
    %20 = vector.load %arg4[%c0_5, %c0_6] : memref<32x32xbf16, #tpu.memory_space<vmem>>, vector<32x32xbf16>
    %cst = arith.constant dense<0.000000e+00> : vector<32x128xf32>
    %21 = tpu.matmul %20, %1, %cst {dimension_numbers = #tpu.dot_dimension_numbers<[1], [0], [0], [1], [0, 0, 1, 1], [], []>} : vector<32x32xbf16>, vector<32x128xbf16>, vector<32x128xf32> -> vector<32x128xf32>
    %22 = arith.addf %19, %21 : vector<32x128xf32>
    %c0_7 = arith.constant 0 : index
    %c0_8 = arith.constant 0 : index
    %23 = vector.load %arg5[%c0_7, %c0_8] : memref<32x1xf32, #tpu.memory_space<vmem>>, vector<32x1xf32>
    %24 = vector.broadcast %23 : vector<32x1xf32> to vector<32x128xf32>
    %25 = arith.addf %22, %24 : vector<32x128xf32>
    %cst_9 = arith.constant 0.000000e+00 : f32
    %26 = vector.broadcast %cst_9 : f32 to vector<32x128xf32>
    %27 = arith.maximumf %25, %26 : vector<32x128xf32>
    %28 = arith.truncf %27 : vector<32x128xf32> to vector<32x128xbf16>
    %c0_10 = arith.constant 0 : index
    %c0_11 = arith.constant 0 : index
    %29 = vector.load %arg6[%c0_10, %c0_11] : memref<32x32xbf16, #tpu.memory_space<vmem>>, vector<32x32xbf16>
    %cst_12 = arith.constant dense<0.000000e+00> : vector<32x128xf32>
    %30 = tpu.matmul %29, %28, %cst_12 {dimension_numbers = #tpu.dot_dimension_numbers<[1], [0], [0], [1], [0, 0, 1, 1], [], []>} : vector<32x32xbf16>, vector<32x128xbf16>, vector<32x128xf32> -> vector<32x128xf32>
    %c0_13 = arith.constant 0 : index
    %c0_14 = arith.constant 0 : index
    %31 = vector.load %arg7[%c0_13, %c0_14] : memref<32x1xf32, #tpu.memory_space<vmem>>, vector<32x1xf32>
    %32 = vector.broadcast %31 : vector<32x1xf32> to vector<32x128xf32>
    %33 = arith.addf %30, %32 : vector<32x128xf32>
    %cst_15 = arith.constant 0.000000e+00 : f32
    %34 = vector.broadcast %cst_15 : f32 to vector<32x128xf32>
    %35 = arith.maximumf %33, %34 : vector<32x128xf32>
    %36 = arith.truncf %35 : vector<32x128xf32> to vector<32x128xbf16>
    %c0_16 = arith.constant 0 : index
    %c0_17 = arith.constant 0 : index
    %37 = vector.load %arg8[%c0_16, %c0_17] : memref<32x32xbf16, #tpu.memory_space<vmem>>, vector<32x32xbf16>
    %cst_18 = arith.constant dense<0.000000e+00> : vector<32x128xf32>
    %38 = tpu.matmul %37, %36, %cst_18 {dimension_numbers = #tpu.dot_dimension_numbers<[1], [0], [0], [1], [0, 0, 1, 1], [], []>} : vector<32x32xbf16>, vector<32x128xbf16>, vector<32x128xf32> -> vector<32x128xf32>
    %c0_19 = arith.constant 0 : index
    %c0_20 = arith.constant 0 : index
    %39 = vector.load %arg9[%c0_19, %c0_20] : memref<32x1xf32, #tpu.memory_space<vmem>>, vector<32x1xf32>
    %40 = vector.broadcast %39 : vector<32x1xf32> to vector<32x128xf32>
    %41 = arith.addf %38, %40 : vector<32x128xf32>
    %cst_21 = arith.constant 0.000000e+00 : f32
    %42 = vector.broadcast %cst_21 : f32 to vector<32x128xf32>
    %43 = arith.maximumf %41, %42 : vector<32x128xf32>
    %44 = arith.truncf %43 : vector<32x128xf32> to vector<32x128xbf16>
    %c0_22 = arith.constant 0 : index
    %c0_23 = arith.constant 0 : index
    %45 = vector.load %arg13[%c0_22, %c0_23] : memref<32x128xbf16, #tpu.memory_space<vmem>>, vector<32x128xbf16>
    tpu.vector_store %arg13[%c0_22, %c0_23], %44 {strides = array<i32>} : memref<32x128xbf16, #tpu.memory_space<vmem>>, vector<32x128xbf16>,
    %c0_24 = arith.constant 0 : index
    %c0_25 = arith.constant 0 : index
    %46 = vector.load %arg13[%c0_24, %c0_25] : memref<32x128xbf16, #tpu.memory_space<vmem>>, vector<32x128xbf16>
    %c0_26 = arith.constant 0 : index
    %c0_27 = arith.constant 0 : index
    %47 = vector.load %arg10[%c0_26, %c0_27] : memref<3x32xbf16, #tpu.memory_space<vmem>>, vector<3x32xbf16>
    %cst_28 = arith.constant dense<0.000000e+00> : vector<3x128xf32>
    %48 = tpu.matmul %47, %46, %cst_28 {dimension_numbers = #tpu.dot_dimension_numbers<[1], [0], [0], [1], [0, 0, 1, 1], [], []>} : vector<3x32xbf16>, vector<32x128xbf16>, vector<3x128xf32> -> vector<3x128xf32>
    %c0_29 = arith.constant 0 : index
    %c0_30 = arith.constant 0 : index
    %49 = vector.load %arg11[%c0_29, %c0_30] : memref<3x1xf32, #tpu.memory_space<vmem>>, vector<3x1xf32>
    %50 = vector.broadcast %49 : vector<3x1xf32> to vector<3x128xf32>
    %51 = arith.addf %48, %50 : vector<3x128xf32>
    %52 = math.tanh %51 : vector<3x128xf32>
    %cst_31 = arith.constant 4.000000e-01 : f32
    %53 = vector.broadcast %cst_31 : f32 to vector<3x128xf32>
    %54 = arith.mulf %52, %53 : vector<3x128xf32>
    %55 = arith.addf %0, %54 : vector<3x128xf32>
    %c0_32 = arith.constant 0 : index
    %c0_33 = arith.constant 0 : index
    %56 = vector.load %arg12[%c0_32, %c0_33] : memref<3x128xf32, #tpu.memory_space<vmem>>, vector<3x128xf32>
    tpu.vector_store %arg12[%c0_32, %c0_33], %55 {strides = array<i32>} : memref<3x128xf32, #tpu.memory_space<vmem>>, vector<3x128xf32>,
    return
  }
  func.func @transform_0(%arg0: i32) -> (i32, i32) {
    %c0_i32 = arith.constant 0 : i32
    %c0_i32_0 = arith.constant 0 : i32
    return %c0_i32, %arg0 : i32, i32
  }
  func.func @transform_1(%arg0: i32) -> (i32, i32) {
    %c0_i32 = arith.constant 0 : i32
    %c0_i32_0 = arith.constant 0 : i32
    return %c0_i32, %arg0 : i32, i32
  }
  func.func @transform_2(%arg0: i32) -> (i32, i32) {
    %c0_i32 = arith.constant 0 : i32
    %c0_i32_0 = arith.constant 0 : i32
    %c0_i32_1 = arith.constant 0 : i32
    return %c0_i32, %c0_i32_0 : i32, i32
  }
  func.func @transform_3(%arg0: i32) -> (i32, i32) {
    %c0_i32 = arith.constant 0 : i32
    %c0_i32_0 = arith.constant 0 : i32
    %c0_i32_1 = arith.constant 0 : i32
    return %c0_i32, %c0_i32_0 : i32, i32
  }
  func.func @transform_4(%arg0: i32) -> (i32, i32) {
    %c0_i32 = arith.constant 0 : i32
    %c0_i32_0 = arith.constant 0 : i32
    %c0_i32_1 = arith.constant 0 : i32
    return %c0_i32, %c0_i32_0 : i32, i32
  }
  func.func @transform_5(%arg0: i32) -> (i32, i32) {
    %c0_i32 = arith.constant 0 : i32
    %c0_i32_0 = arith.constant 0 : i32
    %c0_i32_1 = arith.constant 0 : i32
    return %c0_i32, %c0_i32_0 : i32, i32
  }
  func.func @transform_6(%arg0: i32) -> (i32, i32) {
    %c0_i32 = arith.constant 0 : i32
    %c0_i32_0 = arith.constant 0 : i32
    %c0_i32_1 = arith.constant 0 : i32
    return %c0_i32, %c0_i32_0 : i32, i32
  }
  func.func @transform_7(%arg0: i32) -> (i32, i32) {
    %c0_i32 = arith.constant 0 : i32
    %c0_i32_0 = arith.constant 0 : i32
    %c0_i32_1 = arith.constant 0 : i32
    return %c0_i32, %c0_i32_0 : i32, i32
  }
  func.func @transform_8(%arg0: i32) -> (i32, i32) {
    %c0_i32 = arith.constant 0 : i32
    %c0_i32_0 = arith.constant 0 : i32
    %c0_i32_1 = arith.constant 0 : i32
    return %c0_i32, %c0_i32_0 : i32, i32
  }
  func.func @transform_9(%arg0: i32) -> (i32, i32) {
    %c0_i32 = arith.constant 0 : i32
    %c0_i32_0 = arith.constant 0 : i32
    %c0_i32_1 = arith.constant 0 : i32
    return %c0_i32, %c0_i32_0 : i32, i32
  }
  func.func @transform_10(%arg0: i32) -> (i32, i32) {
    %c0_i32 = arith.constant 0 : i32
    %c0_i32_0 = arith.constant 0 : i32
    %c0_i32_1 = arith.constant 0 : i32
    return %c0_i32, %c0_i32_0 : i32, i32
  }
  func.func @transform_11(%arg0: i32) -> (i32, i32) {
    %c0_i32 = arith.constant 0 : i32
    %c0_i32_0 = arith.constant 0 : i32
    return %c0_i32, %arg0 : i32, i32
  }
  func.func @transform_12(%arg0: i32) -> (i32, i32) {
    %c0_i32 = arith.constant 0 : i32
    %c0_i32_0 = arith.constant 0 : i32
    return %c0_i32, %arg0 : i32, i32
  }
}

module attributes {stable_mosaic.version = 11 : i64} {
  func.func @_interp_layer_kernel(%arg0: i32, %arg1: memref<3x128xf32, #tpu.memory_space<vmem>>, %arg2: memref<32x128xbf16, #tpu.memory_space<vmem>>, %arg3: memref<32x3xf32, #tpu.memory_space<vmem>>, %arg4: memref<32x32xbf16, #tpu.memory_space<vmem>>, %arg5: memref<32x1xf32, #tpu.memory_space<vmem>>, %arg6: memref<32x32xbf16, #tpu.memory_space<vmem>>, %arg7: memref<32x1xf32, #tpu.memory_space<vmem>>, %arg8: memref<32x32xbf16, #tpu.memory_space<vmem>>, %arg9: memref<32x2xf32, #tpu.memory_space<vmem>>, %arg10: memref<3x32xbf16, #tpu.memory_space<vmem>>, %arg11: memref<3x1xf32, #tpu.memory_space<vmem>>, %arg12: memref<3x256xf32, #tpu.memory_space<vmem>>, %arg13: memref<32x256xbf16, #tpu.memory_space<vmem>>) attributes {dimension_semantics = [#tpu.dimension_semantics<parallel>], iteration_bounds = array<i64: 1>, scalar_prefetch = 0 : i64, scratch_operands = 0 : i64, tpu.core_type = #tpu.core_type<tc>, window_params = [{transform_indices = @transform_0, window_bounds = array<i64: 3, 128>}, {transform_indices = @transform_1, window_bounds = array<i64: 32, 128>}, {pipeline_mode = #tpu.pipeline_mode<synchronous>, transform_indices = @transform_2, window_bounds = array<i64: 32, 3>}, {pipeline_mode = #tpu.pipeline_mode<synchronous>, transform_indices = @transform_3, window_bounds = array<i64: 32, 32>}, {pipeline_mode = #tpu.pipeline_mode<synchronous>, transform_indices = @transform_4, window_bounds = array<i64: 32, 1>}, {pipeline_mode = #tpu.pipeline_mode<synchronous>, transform_indices = @transform_5, window_bounds = array<i64: 32, 32>}, {pipeline_mode = #tpu.pipeline_mode<synchronous>, transform_indices = @transform_6, window_bounds = array<i64: 32, 1>}, {pipeline_mode = #tpu.pipeline_mode<synchronous>, transform_indices = @transform_7, window_bounds = array<i64: 32, 32>}, {pipeline_mode = #tpu.pipeline_mode<synchronous>, transform_indices = @transform_8, window_bounds = array<i64: 32, 2>}, {pipeline_mode = #tpu.pipeline_mode<synchronous>, transform_indices = @transform_9, window_bounds = array<i64: 3, 32>}, {pipeline_mode = #tpu.pipeline_mode<synchronous>, transform_indices = @transform_10, window_bounds = array<i64: 3, 1>}, {transform_indices = @transform_11, window_bounds = array<i64: 3, 256>}, {transform_indices = @transform_12, window_bounds = array<i64: 32, 256>}]} {
    %c0 = arith.constant 0 : index
    %c0_0 = arith.constant 0 : index
    %0 = vector.load %arg1[%c0, %c0_0] : memref<3x128xf32, #tpu.memory_space<vmem>>, vector<3x128xf32>
    %c0_1 = arith.constant 0 : index
    %c0_2 = arith.constant 0 : index
    %1 = vector.load %arg2[%c0_1, %c0_2] : memref<32x128xbf16, #tpu.memory_space<vmem>>, vector<32x128xbf16>
    %c0_3 = arith.constant 0 : index
    %c0_4 = arith.constant 0 : index
    %2 = vector.load %arg3[%c0_3, %c0_4] : memref<32x3xf32, #tpu.memory_space<vmem>>, vector<32x3xf32>
    %3 = vector.extract_strided_slice %2 {offsets = [0, 0], sizes = [32, 1], strides = [1, 1]} : vector<32x3xf32> to vector<32x1xf32>
    %4 = vector.extract_strided_slice %0 {offsets = [0, 0], sizes = [1, 128], strides = [1, 1]} : vector<3x128xf32> to vector<1x128xf32>
    %5 = vector.broadcast %3 : vector<32x1xf32> to vector<32x128xf32>
    %6 = vector.broadcast %4 : vector<1x128xf32> to vector<32x128xf32>
    %7 = arith.mulf %5, %6 : vector<32x128xf32>
    %8 = vector.extract_strided_slice %2 {offsets = [0, 1], sizes = [32, 1], strides = [1, 1]} : vector<32x3xf32> to vector<32x1xf32>
    %9 = vector.extract_strided_slice %0 {offsets = [1, 0], sizes = [1, 128], strides = [1, 1]} : vector<3x128xf32> to vector<1x128xf32>
    %10 = vector.broadcast %8 : vector<32x1xf32> to vector<32x128xf32>
    %11 = vector.broadcast %9 : vector<1x128xf32> to vector<32x128xf32>
    %12 = arith.mulf %10, %11 : vector<32x128xf32>
    %13 = arith.addf %7, %12 : vector<32x128xf32>
    %14 = vector.extract_strided_slice %2 {offsets = [0, 2], sizes = [32, 1], strides = [1, 1]} : vector<32x3xf32> to vector<32x1xf32>
    %15 = vector.extract_strided_slice %0 {offsets = [2, 0], sizes = [1, 128], strides = [1, 1]} : vector<3x128xf32> to vector<1x128xf32>
    %16 = vector.broadcast %14 : vector<32x1xf32> to vector<32x128xf32>
    %17 = vector.broadcast %15 : vector<1x128xf32> to vector<32x128xf32>
    %18 = arith.mulf %16, %17 : vector<32x128xf32>
    %19 = arith.addf %13, %18 : vector<32x128xf32>
    %c0_5 = arith.constant 0 : index
    %c0_6 = arith.constant 0 : index
    %20 = vector.load %arg4[%c0_5, %c0_6] : memref<32x32xbf16, #tpu.memory_space<vmem>>, vector<32x32xbf16>
    %cst = arith.constant dense<0.000000e+00> : vector<32x128xf32>
    %21 = tpu.matmul %20, %1, %cst {dimension_numbers = #tpu.dot_dimension_numbers<[1], [0], [0], [1], [0, 0, 1, 1], [], []>} : vector<32x32xbf16>, vector<32x128xbf16>, vector<32x128xf32> -> vector<32x128xf32>
    %22 = arith.addf %19, %21 : vector<32x128xf32>
    %c0_7 = arith.constant 0 : index
    %c0_8 = arith.constant 0 : index
    %23 = vector.load %arg5[%c0_7, %c0_8] : memref<32x1xf32, #tpu.memory_space<vmem>>, vector<32x1xf32>
    %24 = vector.broadcast %23 : vector<32x1xf32> to vector<32x128xf32>
    %25 = arith.addf %22, %24 : vector<32x128xf32>
    %cst_9 = arith.constant 0.000000e+00 : f32
    %26 = vector.broadcast %cst_9 : f32 to vector<32x128xf32>
    %27 = arith.maximumf %25, %26 : vector<32x128xf32>
    %28 = arith.truncf %27 : vector<32x128xf32> to vector<32x128xbf16>
    %c0_10 = arith.constant 0 : index
    %c0_11 = arith.constant 0 : index
    %29 = vector.load %arg6[%c0_10, %c0_11] : memref<32x32xbf16, #tpu.memory_space<vmem>>, vector<32x32xbf16>
    %cst_12 = arith.constant dense<0.000000e+00> : vector<32x128xf32>
    %30 = tpu.matmul %29, %28, %cst_12 {dimension_numbers = #tpu.dot_dimension_numbers<[1], [0], [0], [1], [0, 0, 1, 1], [], []>} : vector<32x32xbf16>, vector<32x128xbf16>, vector<32x128xf32> -> vector<32x128xf32>
    %c0_13 = arith.constant 0 : index
    %c0_14 = arith.constant 0 : index
    %31 = vector.load %arg7[%c0_13, %c0_14] : memref<32x1xf32, #tpu.memory_space<vmem>>, vector<32x1xf32>
    %32 = vector.broadcast %31 : vector<32x1xf32> to vector<32x128xf32>
    %33 = arith.addf %30, %32 : vector<32x128xf32>
    %cst_15 = arith.constant 0.000000e+00 : f32
    %34 = vector.broadcast %cst_15 : f32 to vector<32x128xf32>
    %35 = arith.maximumf %33, %34 : vector<32x128xf32>
    %36 = arith.truncf %35 : vector<32x128xf32> to vector<32x128xbf16>
    %c0_16 = arith.constant 0 : index
    %c0_17 = arith.constant 0 : index
    %37 = vector.load %arg8[%c0_16, %c0_17] : memref<32x32xbf16, #tpu.memory_space<vmem>>, vector<32x32xbf16>
    %cst_18 = arith.constant dense<0.000000e+00> : vector<32x128xf32>
    %38 = tpu.matmul %37, %36, %cst_18 {dimension_numbers = #tpu.dot_dimension_numbers<[1], [0], [0], [1], [0, 0, 1, 1], [], []>} : vector<32x32xbf16>, vector<32x128xbf16>, vector<32x128xf32> -> vector<32x128xf32>
    %c0_19 = arith.constant 0 : index
    %c0_20 = arith.constant 0 : index
    %39 = vector.load %arg9[%c0_19, %c0_20] : memref<32x2xf32, #tpu.memory_space<vmem>>, vector<32x2xf32>
    %40 = vector.extract_strided_slice %39 {offsets = [0, 0], sizes = [32, 1], strides = [1, 1]} : vector<32x2xf32> to vector<32x1xf32>
    %41 = vector.broadcast %40 : vector<32x1xf32> to vector<32x128xf32>
    %42 = arith.addf %38, %41 : vector<32x128xf32>
    %cst_21 = arith.constant 0.000000e+00 : f32
    %43 = vector.broadcast %cst_21 : f32 to vector<32x128xf32>
    %44 = arith.maximumf %42, %43 : vector<32x128xf32>
    %45 = arith.truncf %44 : vector<32x128xf32> to vector<32x128xbf16>
    %c0_22 = arith.constant 0 : index
    %c0_23 = arith.constant 0 : index
    %46 = vector.load %arg13[%c0_22, %c0_23] : memref<32x256xbf16, #tpu.memory_space<vmem>>, vector<32x128xbf16>
    tpu.vector_store %arg13[%c0_22, %c0_23], %45 {strides = array<i32>} : memref<32x256xbf16, #tpu.memory_space<vmem>>, vector<32x128xbf16>,
    %47 = vector.extract_strided_slice %39 {offsets = [0, 1], sizes = [32, 1], strides = [1, 1]} : vector<32x2xf32> to vector<32x1xf32>
    %48 = vector.broadcast %47 : vector<32x1xf32> to vector<32x128xf32>
    %49 = arith.addf %38, %48 : vector<32x128xf32>
    %cst_24 = arith.constant 0.000000e+00 : f32
    %50 = vector.broadcast %cst_24 : f32 to vector<32x128xf32>
    %51 = arith.maximumf %49, %50 : vector<32x128xf32>
    %52 = arith.truncf %51 : vector<32x128xf32> to vector<32x128xbf16>
    %c0_25 = arith.constant 0 : index
    %c128 = arith.constant 128 : index
    %53 = vector.load %arg13[%c0_25, %c128] : memref<32x256xbf16, #tpu.memory_space<vmem>>, vector<32x128xbf16>
    tpu.vector_store %arg13[%c0_25, %c128], %52 {strides = array<i32>} : memref<32x256xbf16, #tpu.memory_space<vmem>>, vector<32x128xbf16>,
    %c0_26 = arith.constant 0 : index
    %c0_27 = arith.constant 0 : index
    %54 = vector.load %arg13[%c0_26, %c0_27] : memref<32x256xbf16, #tpu.memory_space<vmem>>, vector<32x256xbf16>
    %c0_28 = arith.constant 0 : index
    %c0_29 = arith.constant 0 : index
    %55 = vector.load %arg10[%c0_28, %c0_29] : memref<3x32xbf16, #tpu.memory_space<vmem>>, vector<3x32xbf16>
    %cst_30 = arith.constant dense<0.000000e+00> : vector<3x256xf32>
    %56 = tpu.matmul %55, %54, %cst_30 {dimension_numbers = #tpu.dot_dimension_numbers<[1], [0], [0], [1], [0, 0, 1, 1], [], []>} : vector<3x32xbf16>, vector<32x256xbf16>, vector<3x256xf32> -> vector<3x256xf32>
    %c0_31 = arith.constant 0 : index
    %c0_32 = arith.constant 0 : index
    %57 = vector.load %arg11[%c0_31, %c0_32] : memref<3x1xf32, #tpu.memory_space<vmem>>, vector<3x1xf32>
    %58 = vector.broadcast %57 : vector<3x1xf32> to vector<3x256xf32>
    %59 = arith.addf %56, %58 : vector<3x256xf32>
    %60 = math.tanh %59 : vector<3x256xf32>
    %61 = tpu.concatenate %0, %0 in 1 : vector<3x128xf32>, vector<3x128xf32> -> vector<3x256xf32>
    %cst_33 = arith.constant 3.000000e-01 : f32
    %62 = vector.broadcast %cst_33 : f32 to vector<3x256xf32>
    %63 = arith.mulf %60, %62 : vector<3x256xf32>
    %64 = arith.addf %61, %63 : vector<3x256xf32>
    %c0_34 = arith.constant 0 : index
    %c0_35 = arith.constant 0 : index
    %65 = vector.load %arg12[%c0_34, %c0_35] : memref<3x256xf32, #tpu.memory_space<vmem>>, vector<3x256xf32>
    tpu.vector_store %arg12[%c0_34, %c0_35], %64 {strides = array<i32>} : memref<3x256xf32, #tpu.memory_space<vmem>>, vector<3x256xf32>,
    return
  }
  func.func @transform_0(%arg0: i32) -> (i32, i32) {
    %c0_i32 = arith.constant 0 : i32
    %c0_i32_0 = arith.constant 0 : i32
    return %c0_i32, %arg0 : i32, i32
  }
  func.func @transform_1(%arg0: i32) -> (i32, i32) {
    %c0_i32 = arith.constant 0 : i32
    %c0_i32_0 = arith.constant 0 : i32
    return %c0_i32, %arg0 : i32, i32
  }
  func.func @transform_2(%arg0: i32) -> (i32, i32) {
    %c0_i32 = arith.constant 0 : i32
    %c0_i32_0 = arith.constant 0 : i32
    %c0_i32_1 = arith.constant 0 : i32
    return %c0_i32, %c0_i32_0 : i32, i32
  }
  func.func @transform_3(%arg0: i32) -> (i32, i32) {
    %c0_i32 = arith.constant 0 : i32
    %c0_i32_0 = arith.constant 0 : i32
    %c0_i32_1 = arith.constant 0 : i32
    return %c0_i32, %c0_i32_0 : i32, i32
  }
  func.func @transform_4(%arg0: i32) -> (i32, i32) {
    %c0_i32 = arith.constant 0 : i32
    %c0_i32_0 = arith.constant 0 : i32
    %c0_i32_1 = arith.constant 0 : i32
    return %c0_i32, %c0_i32_0 : i32, i32
  }
  func.func @transform_5(%arg0: i32) -> (i32, i32) {
    %c0_i32 = arith.constant 0 : i32
    %c0_i32_0 = arith.constant 0 : i32
    %c0_i32_1 = arith.constant 0 : i32
    return %c0_i32, %c0_i32_0 : i32, i32
  }
  func.func @transform_6(%arg0: i32) -> (i32, i32) {
    %c0_i32 = arith.constant 0 : i32
    %c0_i32_0 = arith.constant 0 : i32
    %c0_i32_1 = arith.constant 0 : i32
    return %c0_i32, %c0_i32_0 : i32, i32
  }
  func.func @transform_7(%arg0: i32) -> (i32, i32) {
    %c0_i32 = arith.constant 0 : i32
    %c0_i32_0 = arith.constant 0 : i32
    %c0_i32_1 = arith.constant 0 : i32
    return %c0_i32, %c0_i32_0 : i32, i32
  }
  func.func @transform_8(%arg0: i32) -> (i32, i32) {
    %c0_i32 = arith.constant 0 : i32
    %c0_i32_0 = arith.constant 0 : i32
    %c0_i32_1 = arith.constant 0 : i32
    return %c0_i32, %c0_i32_0 : i32, i32
  }
  func.func @transform_9(%arg0: i32) -> (i32, i32) {
    %c0_i32 = arith.constant 0 : i32
    %c0_i32_0 = arith.constant 0 : i32
    %c0_i32_1 = arith.constant 0 : i32
    return %c0_i32, %c0_i32_0 : i32, i32
  }
  func.func @transform_10(%arg0: i32) -> (i32, i32) {
    %c0_i32 = arith.constant 0 : i32
    %c0_i32_0 = arith.constant 0 : i32
    %c0_i32_1 = arith.constant 0 : i32
    return %c0_i32, %c0_i32_0 : i32, i32
  }
  func.func @transform_11(%arg0: i32) -> (i32, i32) {
    %c0_i32 = arith.constant 0 : i32
    %c0_i32_0 = arith.constant 0 : i32
    return %c0_i32, %arg0 : i32, i32
  }
  func.func @transform_12(%arg0: i32) -> (i32, i32) {
    %c0_i32 = arith.constant 0 : i32
    %c0_i32_0 = arith.constant 0 : i32
    return %c0_i32, %arg0 : i32, i32
  }
}

module attributes {stable_mosaic.version = 11 : i64} {
  func.func @_interp_layer_kernel(%arg0: i32, %arg1: memref<3x256xf32, #tpu.memory_space<vmem>>, %arg2: memref<32x256xbf16, #tpu.memory_space<vmem>>, %arg3: memref<32x3xf32, #tpu.memory_space<vmem>>, %arg4: memref<32x32xbf16, #tpu.memory_space<vmem>>, %arg5: memref<32x1xf32, #tpu.memory_space<vmem>>, %arg6: memref<32x32xbf16, #tpu.memory_space<vmem>>, %arg7: memref<32x1xf32, #tpu.memory_space<vmem>>, %arg8: memref<32x32xbf16, #tpu.memory_space<vmem>>, %arg9: memref<32x8xf32, #tpu.memory_space<vmem>>, %arg10: memref<3x32xbf16, #tpu.memory_space<vmem>>, %arg11: memref<3x1xf32, #tpu.memory_space<vmem>>, %arg12: memref<3x2048xf32, #tpu.memory_space<vmem>>, %arg13: memref<32x2048xbf16, #tpu.memory_space<vmem>>) attributes {dimension_semantics = [#tpu.dimension_semantics<parallel>], iteration_bounds = array<i64: 1>, scalar_prefetch = 0 : i64, scratch_operands = 0 : i64, tpu.core_type = #tpu.core_type<tc>, window_params = [{transform_indices = @transform_0, window_bounds = array<i64: 3, 256>}, {transform_indices = @transform_1, window_bounds = array<i64: 32, 256>}, {pipeline_mode = #tpu.pipeline_mode<synchronous>, transform_indices = @transform_2, window_bounds = array<i64: 32, 3>}, {pipeline_mode = #tpu.pipeline_mode<synchronous>, transform_indices = @transform_3, window_bounds = array<i64: 32, 32>}, {pipeline_mode = #tpu.pipeline_mode<synchronous>, transform_indices = @transform_4, window_bounds = array<i64: 32, 1>}, {pipeline_mode = #tpu.pipeline_mode<synchronous>, transform_indices = @transform_5, window_bounds = array<i64: 32, 32>}, {pipeline_mode = #tpu.pipeline_mode<synchronous>, transform_indices = @transform_6, window_bounds = array<i64: 32, 1>}, {pipeline_mode = #tpu.pipeline_mode<synchronous>, transform_indices = @transform_7, window_bounds = array<i64: 32, 32>}, {pipeline_mode = #tpu.pipeline_mode<synchronous>, transform_indices = @transform_8, window_bounds = array<i64: 32, 8>}, {pipeline_mode = #tpu.pipeline_mode<synchronous>, transform_indices = @transform_9, window_bounds = array<i64: 3, 32>}, {pipeline_mode = #tpu.pipeline_mode<synchronous>, transform_indices = @transform_10, window_bounds = array<i64: 3, 1>}, {transform_indices = @transform_11, window_bounds = array<i64: 3, 2048>}, {transform_indices = @transform_12, window_bounds = array<i64: 32, 2048>}]} {
    %c0 = arith.constant 0 : index
    %c0_0 = arith.constant 0 : index
    %0 = vector.load %arg1[%c0, %c0_0] : memref<3x256xf32, #tpu.memory_space<vmem>>, vector<3x256xf32>
    %c0_1 = arith.constant 0 : index
    %c0_2 = arith.constant 0 : index
    %1 = vector.load %arg2[%c0_1, %c0_2] : memref<32x256xbf16, #tpu.memory_space<vmem>>, vector<32x256xbf16>
    %c0_3 = arith.constant 0 : index
    %c0_4 = arith.constant 0 : index
    %2 = vector.load %arg3[%c0_3, %c0_4] : memref<32x3xf32, #tpu.memory_space<vmem>>, vector<32x3xf32>
    %3 = vector.extract_strided_slice %2 {offsets = [0, 0], sizes = [32, 1], strides = [1, 1]} : vector<32x3xf32> to vector<32x1xf32>
    %4 = vector.extract_strided_slice %0 {offsets = [0, 0], sizes = [1, 256], strides = [1, 1]} : vector<3x256xf32> to vector<1x256xf32>
    %5 = vector.broadcast %3 : vector<32x1xf32> to vector<32x256xf32>
    %6 = vector.broadcast %4 : vector<1x256xf32> to vector<32x256xf32>
    %7 = arith.mulf %5, %6 : vector<32x256xf32>
    %8 = vector.extract_strided_slice %2 {offsets = [0, 1], sizes = [32, 1], strides = [1, 1]} : vector<32x3xf32> to vector<32x1xf32>
    %9 = vector.extract_strided_slice %0 {offsets = [1, 0], sizes = [1, 256], strides = [1, 1]} : vector<3x256xf32> to vector<1x256xf32>
    %10 = vector.broadcast %8 : vector<32x1xf32> to vector<32x256xf32>
    %11 = vector.broadcast %9 : vector<1x256xf32> to vector<32x256xf32>
    %12 = arith.mulf %10, %11 : vector<32x256xf32>
    %13 = arith.addf %7, %12 : vector<32x256xf32>
    %14 = vector.extract_strided_slice %2 {offsets = [0, 2], sizes = [32, 1], strides = [1, 1]} : vector<32x3xf32> to vector<32x1xf32>
    %15 = vector.extract_strided_slice %0 {offsets = [2, 0], sizes = [1, 256], strides = [1, 1]} : vector<3x256xf32> to vector<1x256xf32>
    %16 = vector.broadcast %14 : vector<32x1xf32> to vector<32x256xf32>
    %17 = vector.broadcast %15 : vector<1x256xf32> to vector<32x256xf32>
    %18 = arith.mulf %16, %17 : vector<32x256xf32>
    %19 = arith.addf %13, %18 : vector<32x256xf32>
    %c0_5 = arith.constant 0 : index
    %c0_6 = arith.constant 0 : index
    %20 = vector.load %arg4[%c0_5, %c0_6] : memref<32x32xbf16, #tpu.memory_space<vmem>>, vector<32x32xbf16>
    %cst = arith.constant dense<0.000000e+00> : vector<32x256xf32>
    %21 = tpu.matmul %20, %1, %cst {dimension_numbers = #tpu.dot_dimension_numbers<[1], [0], [0], [1], [0, 0, 1, 1], [], []>} : vector<32x32xbf16>, vector<32x256xbf16>, vector<32x256xf32> -> vector<32x256xf32>
    %22 = arith.addf %19, %21 : vector<32x256xf32>
    %c0_7 = arith.constant 0 : index
    %c0_8 = arith.constant 0 : index
    %23 = vector.load %arg5[%c0_7, %c0_8] : memref<32x1xf32, #tpu.memory_space<vmem>>, vector<32x1xf32>
    %24 = vector.broadcast %23 : vector<32x1xf32> to vector<32x256xf32>
    %25 = arith.addf %22, %24 : vector<32x256xf32>
    %cst_9 = arith.constant 0.000000e+00 : f32
    %26 = vector.broadcast %cst_9 : f32 to vector<32x256xf32>
    %27 = arith.maximumf %25, %26 : vector<32x256xf32>
    %28 = arith.truncf %27 : vector<32x256xf32> to vector<32x256xbf16>
    %c0_10 = arith.constant 0 : index
    %c0_11 = arith.constant 0 : index
    %29 = vector.load %arg6[%c0_10, %c0_11] : memref<32x32xbf16, #tpu.memory_space<vmem>>, vector<32x32xbf16>
    %cst_12 = arith.constant dense<0.000000e+00> : vector<32x256xf32>
    %30 = tpu.matmul %29, %28, %cst_12 {dimension_numbers = #tpu.dot_dimension_numbers<[1], [0], [0], [1], [0, 0, 1, 1], [], []>} : vector<32x32xbf16>, vector<32x256xbf16>, vector<32x256xf32> -> vector<32x256xf32>
    %c0_13 = arith.constant 0 : index
    %c0_14 = arith.constant 0 : index
    %31 = vector.load %arg7[%c0_13, %c0_14] : memref<32x1xf32, #tpu.memory_space<vmem>>, vector<32x1xf32>
    %32 = vector.broadcast %31 : vector<32x1xf32> to vector<32x256xf32>
    %33 = arith.addf %30, %32 : vector<32x256xf32>
    %cst_15 = arith.constant 0.000000e+00 : f32
    %34 = vector.broadcast %cst_15 : f32 to vector<32x256xf32>
    %35 = arith.maximumf %33, %34 : vector<32x256xf32>
    %36 = arith.truncf %35 : vector<32x256xf32> to vector<32x256xbf16>
    %c0_16 = arith.constant 0 : index
    %c0_17 = arith.constant 0 : index
    %37 = vector.load %arg8[%c0_16, %c0_17] : memref<32x32xbf16, #tpu.memory_space<vmem>>, vector<32x32xbf16>
    %cst_18 = arith.constant dense<0.000000e+00> : vector<32x256xf32>
    %38 = tpu.matmul %37, %36, %cst_18 {dimension_numbers = #tpu.dot_dimension_numbers<[1], [0], [0], [1], [0, 0, 1, 1], [], []>} : vector<32x32xbf16>, vector<32x256xbf16>, vector<32x256xf32> -> vector<32x256xf32>
    %c0_19 = arith.constant 0 : index
    %c0_20 = arith.constant 0 : index
    %39 = vector.load %arg9[%c0_19, %c0_20] : memref<32x8xf32, #tpu.memory_space<vmem>>, vector<32x8xf32>
    %40 = vector.extract_strided_slice %39 {offsets = [0, 0], sizes = [32, 1], strides = [1, 1]} : vector<32x8xf32> to vector<32x1xf32>
    %41 = vector.broadcast %40 : vector<32x1xf32> to vector<32x256xf32>
    %42 = arith.addf %38, %41 : vector<32x256xf32>
    %cst_21 = arith.constant 0.000000e+00 : f32
    %43 = vector.broadcast %cst_21 : f32 to vector<32x256xf32>
    %44 = arith.maximumf %42, %43 : vector<32x256xf32>
    %45 = arith.truncf %44 : vector<32x256xf32> to vector<32x256xbf16>
    %c0_22 = arith.constant 0 : index
    %c0_23 = arith.constant 0 : index
    %46 = vector.load %arg13[%c0_22, %c0_23] : memref<32x2048xbf16, #tpu.memory_space<vmem>>, vector<32x256xbf16>
    tpu.vector_store %arg13[%c0_22, %c0_23], %45 {strides = array<i32>} : memref<32x2048xbf16, #tpu.memory_space<vmem>>, vector<32x256xbf16>,
    %47 = vector.extract_strided_slice %39 {offsets = [0, 1], sizes = [32, 1], strides = [1, 1]} : vector<32x8xf32> to vector<32x1xf32>
    %48 = vector.broadcast %47 : vector<32x1xf32> to vector<32x256xf32>
    %49 = arith.addf %38, %48 : vector<32x256xf32>
    %cst_24 = arith.constant 0.000000e+00 : f32
    %50 = vector.broadcast %cst_24 : f32 to vector<32x256xf32>
    %51 = arith.maximumf %49, %50 : vector<32x256xf32>
    %52 = arith.truncf %51 : vector<32x256xf32> to vector<32x256xbf16>
    %c0_25 = arith.constant 0 : index
    %c256 = arith.constant 256 : index
    %53 = vector.load %arg13[%c0_25, %c256] : memref<32x2048xbf16, #tpu.memory_space<vmem>>, vector<32x256xbf16>
    tpu.vector_store %arg13[%c0_25, %c256], %52 {strides = array<i32>} : memref<32x2048xbf16, #tpu.memory_space<vmem>>, vector<32x256xbf16>,
    %54 = vector.extract_strided_slice %39 {offsets = [0, 2], sizes = [32, 1], strides = [1, 1]} : vector<32x8xf32> to vector<32x1xf32>
    %55 = vector.broadcast %54 : vector<32x1xf32> to vector<32x256xf32>
    %56 = arith.addf %38, %55 : vector<32x256xf32>
    %cst_26 = arith.constant 0.000000e+00 : f32
    %57 = vector.broadcast %cst_26 : f32 to vector<32x256xf32>
    %58 = arith.maximumf %56, %57 : vector<32x256xf32>
    %59 = arith.truncf %58 : vector<32x256xf32> to vector<32x256xbf16>
    %c0_27 = arith.constant 0 : index
    %c512 = arith.constant 512 : index
    %60 = vector.load %arg13[%c0_27, %c512] : memref<32x2048xbf16, #tpu.memory_space<vmem>>, vector<32x256xbf16>
    tpu.vector_store %arg13[%c0_27, %c512], %59 {strides = array<i32>} : memref<32x2048xbf16, #tpu.memory_space<vmem>>, vector<32x256xbf16>,
    %61 = vector.extract_strided_slice %39 {offsets = [0, 3], sizes = [32, 1], strides = [1, 1]} : vector<32x8xf32> to vector<32x1xf32>
    %62 = vector.broadcast %61 : vector<32x1xf32> to vector<32x256xf32>
    %63 = arith.addf %38, %62 : vector<32x256xf32>
    %cst_28 = arith.constant 0.000000e+00 : f32
    %64 = vector.broadcast %cst_28 : f32 to vector<32x256xf32>
    %65 = arith.maximumf %63, %64 : vector<32x256xf32>
    %66 = arith.truncf %65 : vector<32x256xf32> to vector<32x256xbf16>
    %c0_29 = arith.constant 0 : index
    %c768 = arith.constant 768 : index
    %67 = vector.load %arg13[%c0_29, %c768] : memref<32x2048xbf16, #tpu.memory_space<vmem>>, vector<32x256xbf16>
    tpu.vector_store %arg13[%c0_29, %c768], %66 {strides = array<i32>} : memref<32x2048xbf16, #tpu.memory_space<vmem>>, vector<32x256xbf16>,
    %68 = vector.extract_strided_slice %39 {offsets = [0, 4], sizes = [32, 1], strides = [1, 1]} : vector<32x8xf32> to vector<32x1xf32>
    %69 = vector.broadcast %68 : vector<32x1xf32> to vector<32x256xf32>
    %70 = arith.addf %38, %69 : vector<32x256xf32>
    %cst_30 = arith.constant 0.000000e+00 : f32
    %71 = vector.broadcast %cst_30 : f32 to vector<32x256xf32>
    %72 = arith.maximumf %70, %71 : vector<32x256xf32>
    %73 = arith.truncf %72 : vector<32x256xf32> to vector<32x256xbf16>
    %c0_31 = arith.constant 0 : index
    %c1024 = arith.constant 1024 : index
    %74 = vector.load %arg13[%c0_31, %c1024] : memref<32x2048xbf16, #tpu.memory_space<vmem>>, vector<32x256xbf16>
    tpu.vector_store %arg13[%c0_31, %c1024], %73 {strides = array<i32>} : memref<32x2048xbf16, #tpu.memory_space<vmem>>, vector<32x256xbf16>,
    %75 = vector.extract_strided_slice %39 {offsets = [0, 5], sizes = [32, 1], strides = [1, 1]} : vector<32x8xf32> to vector<32x1xf32>
    %76 = vector.broadcast %75 : vector<32x1xf32> to vector<32x256xf32>
    %77 = arith.addf %38, %76 : vector<32x256xf32>
    %cst_32 = arith.constant 0.000000e+00 : f32
    %78 = vector.broadcast %cst_32 : f32 to vector<32x256xf32>
    %79 = arith.maximumf %77, %78 : vector<32x256xf32>
    %80 = arith.truncf %79 : vector<32x256xf32> to vector<32x256xbf16>
    %c0_33 = arith.constant 0 : index
    %c1280 = arith.constant 1280 : index
    %81 = vector.load %arg13[%c0_33, %c1280] : memref<32x2048xbf16, #tpu.memory_space<vmem>>, vector<32x256xbf16>
    tpu.vector_store %arg13[%c0_33, %c1280], %80 {strides = array<i32>} : memref<32x2048xbf16, #tpu.memory_space<vmem>>, vector<32x256xbf16>,
    %82 = vector.extract_strided_slice %39 {offsets = [0, 6], sizes = [32, 1], strides = [1, 1]} : vector<32x8xf32> to vector<32x1xf32>
    %83 = vector.broadcast %82 : vector<32x1xf32> to vector<32x256xf32>
    %84 = arith.addf %38, %83 : vector<32x256xf32>
    %cst_34 = arith.constant 0.000000e+00 : f32
    %85 = vector.broadcast %cst_34 : f32 to vector<32x256xf32>
    %86 = arith.maximumf %84, %85 : vector<32x256xf32>
    %87 = arith.truncf %86 : vector<32x256xf32> to vector<32x256xbf16>
    %c0_35 = arith.constant 0 : index
    %c1536 = arith.constant 1536 : index
    %88 = vector.load %arg13[%c0_35, %c1536] : memref<32x2048xbf16, #tpu.memory_space<vmem>>, vector<32x256xbf16>
    tpu.vector_store %arg13[%c0_35, %c1536], %87 {strides = array<i32>} : memref<32x2048xbf16, #tpu.memory_space<vmem>>, vector<32x256xbf16>,
    %89 = vector.extract_strided_slice %39 {offsets = [0, 7], sizes = [32, 1], strides = [1, 1]} : vector<32x8xf32> to vector<32x1xf32>
    %90 = vector.broadcast %89 : vector<32x1xf32> to vector<32x256xf32>
    %91 = arith.addf %38, %90 : vector<32x256xf32>
    %cst_36 = arith.constant 0.000000e+00 : f32
    %92 = vector.broadcast %cst_36 : f32 to vector<32x256xf32>
    %93 = arith.maximumf %91, %92 : vector<32x256xf32>
    %94 = arith.truncf %93 : vector<32x256xf32> to vector<32x256xbf16>
    %c0_37 = arith.constant 0 : index
    %c1792 = arith.constant 1792 : index
    %95 = vector.load %arg13[%c0_37, %c1792] : memref<32x2048xbf16, #tpu.memory_space<vmem>>, vector<32x256xbf16>
    tpu.vector_store %arg13[%c0_37, %c1792], %94 {strides = array<i32>} : memref<32x2048xbf16, #tpu.memory_space<vmem>>, vector<32x256xbf16>,
    %c0_38 = arith.constant 0 : index
    %c0_39 = arith.constant 0 : index
    %96 = vector.load %arg13[%c0_38, %c0_39] : memref<32x2048xbf16, #tpu.memory_space<vmem>>, vector<32x2048xbf16>
    %c0_40 = arith.constant 0 : index
    %c0_41 = arith.constant 0 : index
    %97 = vector.load %arg10[%c0_40, %c0_41] : memref<3x32xbf16, #tpu.memory_space<vmem>>, vector<3x32xbf16>
    %cst_42 = arith.constant dense<0.000000e+00> : vector<3x2048xf32>
    %98 = tpu.matmul %97, %96, %cst_42 {dimension_numbers = #tpu.dot_dimension_numbers<[1], [0], [0], [1], [0, 0, 1, 1], [], []>} : vector<3x32xbf16>, vector<32x2048xbf16>, vector<3x2048xf32> -> vector<3x2048xf32>
    %c0_43 = arith.constant 0 : index
    %c0_44 = arith.constant 0 : index
    %99 = vector.load %arg11[%c0_43, %c0_44] : memref<3x1xf32, #tpu.memory_space<vmem>>, vector<3x1xf32>
    %100 = vector.broadcast %99 : vector<3x1xf32> to vector<3x2048xf32>
    %101 = arith.addf %98, %100 : vector<3x2048xf32>
    %102 = math.tanh %101 : vector<3x2048xf32>
    %103 = tpu.concatenate %0, %0, %0, %0, %0, %0, %0, %0 in 1 : vector<3x256xf32>, vector<3x256xf32>, vector<3x256xf32>, vector<3x256xf32>, vector<3x256xf32>, vector<3x256xf32>, vector<3x256xf32>, vector<3x256xf32> -> vector<3x2048xf32>
    %cst_45 = arith.constant 2.000000e-01 : f32
    %104 = vector.broadcast %cst_45 : f32 to vector<3x2048xf32>
    %105 = arith.mulf %102, %104 : vector<3x2048xf32>
    %106 = arith.addf %103, %105 : vector<3x2048xf32>
    %c0_46 = arith.constant 0 : index
    %c0_47 = arith.constant 0 : index
    %107 = vector.load %arg12[%c0_46, %c0_47] : memref<3x2048xf32, #tpu.memory_space<vmem>>, vector<3x2048xf32>
    tpu.vector_store %arg12[%c0_46, %c0_47], %106 {strides = array<i32>} : memref<3x2048xf32, #tpu.memory_space<vmem>>, vector<3x2048xf32>,
    return
  }
  func.func @transform_0(%arg0: i32) -> (i32, i32) {
    %c0_i32 = arith.constant 0 : i32
    %c0_i32_0 = arith.constant 0 : i32
    return %c0_i32, %arg0 : i32, i32
  }
  func.func @transform_1(%arg0: i32) -> (i32, i32) {
    %c0_i32 = arith.constant 0 : i32
    %c0_i32_0 = arith.constant 0 : i32
    return %c0_i32, %arg0 : i32, i32
  }
  func.func @transform_2(%arg0: i32) -> (i32, i32) {
    %c0_i32 = arith.constant 0 : i32
    %c0_i32_0 = arith.constant 0 : i32
    %c0_i32_1 = arith.constant 0 : i32
    return %c0_i32, %c0_i32_0 : i32, i32
  }
  func.func @transform_3(%arg0: i32) -> (i32, i32) {
    %c0_i32 = arith.constant 0 : i32
    %c0_i32_0 = arith.constant 0 : i32
    %c0_i32_1 = arith.constant 0 : i32
    return %c0_i32, %c0_i32_0 : i32, i32
  }
  func.func @transform_4(%arg0: i32) -> (i32, i32) {
    %c0_i32 = arith.constant 0 : i32
    %c0_i32_0 = arith.constant 0 : i32
    %c0_i32_1 = arith.constant 0 : i32
    return %c0_i32, %c0_i32_0 : i32, i32
  }
  func.func @transform_5(%arg0: i32) -> (i32, i32) {
    %c0_i32 = arith.constant 0 : i32
    %c0_i32_0 = arith.constant 0 : i32
    %c0_i32_1 = arith.constant 0 : i32
    return %c0_i32, %c0_i32_0 : i32, i32
  }
  func.func @transform_6(%arg0: i32) -> (i32, i32) {
    %c0_i32 = arith.constant 0 : i32
    %c0_i32_0 = arith.constant 0 : i32
    %c0_i32_1 = arith.constant 0 : i32
    return %c0_i32, %c0_i32_0 : i32, i32
  }
  func.func @transform_7(%arg0: i32) -> (i32, i32) {
    %c0_i32 = arith.constant 0 : i32
    %c0_i32_0 = arith.constant 0 : i32
    %c0_i32_1 = arith.constant 0 : i32
    return %c0_i32, %c0_i32_0 : i32, i32
  }
  func.func @transform_8(%arg0: i32) -> (i32, i32) {
    %c0_i32 = arith.constant 0 : i32
    %c0_i32_0 = arith.constant 0 : i32
    %c0_i32_1 = arith.constant 0 : i32
    return %c0_i32, %c0_i32_0 : i32, i32
  }
  func.func @transform_9(%arg0: i32) -> (i32, i32) {
    %c0_i32 = arith.constant 0 : i32
    %c0_i32_0 = arith.constant 0 : i32
    %c0_i32_1 = arith.constant 0 : i32
    return %c0_i32, %c0_i32_0 : i32, i32
  }
  func.func @transform_10(%arg0: i32) -> (i32, i32) {
    %c0_i32 = arith.constant 0 : i32
    %c0_i32_0 = arith.constant 0 : i32
    %c0_i32_1 = arith.constant 0 : i32
    return %c0_i32, %c0_i32_0 : i32, i32
  }
  func.func @transform_11(%arg0: i32) -> (i32, i32) {
    %c0_i32 = arith.constant 0 : i32
    %c0_i32_0 = arith.constant 0 : i32
    return %c0_i32, %arg0 : i32, i32
  }
  func.func @transform_12(%arg0: i32) -> (i32, i32) {
    %c0_i32 = arith.constant 0 : i32
    %c0_i32_0 = arith.constant 0 : i32
    return %c0_i32, %arg0 : i32, i32
  }
}

</mosaic_0001>

<bundles_post_ra>
// kernel: _lambda_.4
= control target key start
LH: loop header
LB: loop body
LE: loop exit
PB: predicated region body
PF: predicated region fallthrough
CT: control target
= control target key end

     0   :  { %v566_v0 = vmov 1   ;;  %v567_v5 = vmov 2   ;;  %vm151_vm0 = vcmask 261120   ;;  %v568_v8 = vmov 0   ;;  %s787_s2 = inlined_call_operand.vmem [shape: f32[32,3], index: 2, kind: input, shape index: {}]   ;;  %s788_s1 = inlined_call_operand.vmem [shape: bf16[32,128], index: 1, kind: input, shape index: {}]   ;;  %s789_s3 = inlined_call_operand.vmem [shape: bf16[32,32], index: 3, kind: input, shape index: {}]   ;;  %s790_s4 = inlined_call_operand.vmem [shape: f32[32,1], index: 4, kind: input, shape index: {}]   ;;  %s791_s6 = inlined_call_operand.vmem [shape: f32[32,1], index: 6, kind: input, shape index: {}]   ;;  %s792_s8 = inlined_call_operand.vmem [shape: f32[32,2], index: 8, kind: input, shape index: {}]   ;;  %s793_s0 = inlined_call_operand.vmem [shape: f32[3,128], index: 0, kind: input, shape index: {}]   ;;  %s794_s5 = inlined_call_operand.vmem [shape: bf16[32,32], index: 5, kind: input, shape index: {}]   ;;  %s795_s7 = inlined_call_operand.vmem [shape: bf16[32,32], index: 7, kind: input, shape index: {}]   ;;  %s796_s12 = inlined_call_operand.vmem [shape: bf16[32,256], index: 12, kind: output, shape index: {1}]   ;;  %s797_s10 = inlined_call_operand.vmem [shape: f32[3,1], index: 10, kind: input, shape index: {}]   ;;  %s798_s9 = inlined_call_operand.vmem [shape: bf16[3,32], index: 9, kind: input, shape index: {}]   ;;  %s799_s11 = inlined_call_operand.vmem [shape: f32[3,256], index: 11, kind: output, shape index: {0}]  }
   0x1   :  { %551 = vset.pattern.permute.xlu0 %v566_v0  ;;  %547 = vset.pattern.permute.xlu1 %v566_v0  ;;  %v48_v1 = vld [vmem:[%s787_s2 + $0x10] sm:$0xff]  ;;  %v47_v2 = vld [vmem:[%s787_s2 + $0x8] sm:$0xff]  ;;  %v532_v4 = vld [vmem:[%s788_s1] sm:$0xff]  ;;  %vm464_vm1 = vcmask 1043456  }
   0x2   :  { %v533_v3 = vld [vmem:[%s788_s1 + $0x8] sm:$0xff]  ;;  %84 = vperm.xlu1 %547, %v48_v1   ;;  %80 = vperm.xlu0 %551, %v47_v2   ;;  %v49_v6 = vld [vmem:[%s787_s2 + $0x18] sm:$0xff]  ;;  %v534_v7 = vld [vmem:[%s789_s3] sm:$0xff] }
   0x3   :  { %164 = vmatpush.bf16.msra.mxu0 %v533_v3  ;;  %548 = vset.pattern.permute.xlu2 %v567_v5  ;;  %v46_v9 = vld [vmem:[%s787_s2] sm:$0xff]  ;;  %v535_v10 = vld [vmem:[%s789_s3 + $0x8] sm:$0xff]  ;;  %v183_v12 = vld [vmem:[%s790_s4 + $0x10] sm:$0xff] }
   0x4   :  { %109 = vperm.xlu2 %548, %v48_v1   ;;  %v181_v11 = vld [vmem:[%s790_s4] sm:$0xff]  ;;  %v184_v13 = vld [vmem:[%s790_s4 + $0x18] sm:$0xff]  ;;  %v220_v14 = vld [vmem:[%s791_s6 + $0x8] sm:$0xff] }
   0x5   :  { %v182_v15 = vld [vmem:[%s790_s4 + $0x8] sm:$0xff]  ;;  %v221_v16 = vld [vmem:[%s791_s6 + $0x10] sm:$0xff]  ;;  %v323_v17 = vld [vmem:[%s792_s8] sm:$0xff] }
   0x6   :  { %v222_v18 = vld [vmem:[%s791_s6 + $0x18] sm:$0xff]  ;;  %v219_v19 = vld [vmem:[%s791_s6] sm:$0xff]  ;;  %v325_v20 = vld [vmem:[%s792_s8 + $0x10] sm:$0xff] }
   0x7   :  { %165 = vmatpush.bf16.msra.mxu0 %v532_v4  ;;  %v326_v21 = vld [vmem:[%s792_s8 + $0x18] sm:$0xff]  ;;  %v324_v22 = vld [vmem:[%s792_s8 + $0x8] sm:$0xff]  ;;  %v705_v33 = vld [vmem:[%s793_s0] sm:$0x7] }
   0x8   :  { %v70_v35 = vperm.slane %v705_v33, 0  ;;  %v91_v37 = vperm.slane %v705_v33, 1  ;;  %v116_v38 = vperm.slane %v705_v33, 2 }
   0xa   :  { %88 = vperm.xlu1 %547, %v49_v6   ;;  %552 = vset.pattern.permute.xlu0 %v568_v8 }
   0xb   :  { %62 = vperm.xlu0 %552, %v48_v1   ;;  %492 = vmatmul.msk.bf16.vlgmr.msra.gmra.mxu0 %vm151_vm0, %v534_v7 }
   0xc   :  { %113 = vperm.xlu2 %548, %v49_v6  }
  0x12   :  { %549 = vset.pattern.permute.xlu1 %v568_v8 }
  0x13   :  { %67 = vperm.xlu0 %552, %v49_v6   ;;  %57 = vperm.xlu1 %549, %v47_v2  }
  0x14   :  { %550 = vset.pattern.permute.xlu2 %v566_v0 }
  0x15   :  { %76 = vperm.xlu2 %550, %v46_v9  }
  0x1b   :  { %553 = vset.pattern.permute.xlu1 %v567_v5  ;;  %52 = vperm.xlu0 %552, %v46_v9  }
  0x1c   :  { %493 = vmatmul.msk.bf16.gmra.mxu0 %vm151_vm0, %v535_v10  ;;  %101 = vperm.xlu1 %553, %v46_v9  }
  0x1d   :  { %554 = vset.pattern.permute.xlu2 %v567_v5 }
  0x1e   :  { %105 = vperm.xlu2 %554, %v47_v2  }
  0x23   :  { %187 = vperm.xlu0 %552, %v181_v11  }
  0x24   :  { %555 = vset.pattern.permute.xlu1 %v568_v8 }
  0x25   :  { %197 = vperm.xlu1 %555, %v183_v12  }
  0x26   :  { %556 = vset.pattern.permute.xlu2 %v568_v8 }
  0x27   :  { %202 = vperm.xlu2 %556, %v184_v13  }
  0x2b   :  { %230 = vperm.xlu0 %552, %v220_v14  }
  0x2d   :  { %192 = vperm.xlu1 %555, %v182_v15  }
  0x2f   :  { %235 = vperm.xlu2 %556, %v221_v16  }
  0x33   :  { %329 = vperm.xlu0 %552, %v323_v17  }
  0x35   :  { %240 = vperm.xlu1 %555, %v222_v18   ;;  %v537_v18 = vld [vmem:[%s794_s5 + $0x8] sm:$0xff] }
  0x37   :  { %225 = vperm.xlu2 %556, %v219_v19  }
  0x3b   :  { %558 = vset.pattern.permute.xlu0 %v566_v0 }
  0x3c   :  { %376 = vperm.xlu0 %558, %v326_v21  }
  0x3d   :  { %339 = vperm.xlu1 %555, %v325_v20  }
  0x3f   :  { %344 = vperm.xlu2 %556, %v326_v21  }
  0x44   :  { %561 = vset.pattern.permute.xlu0 %v568_v8 }
  0x45   :  { %334 = vperm.xlu1 %555, %v324_v22  }
  0x47   :  { %557 = vset.pattern.permute.xlu2 %v566_v0 }
  0x48   :  { %372 = vperm.xlu2 %557, %v325_v20  }
  0x4d   :  { %559 = vset.pattern.permute.xlu1 %v566_v0 }
  0x4e   :  { %364 = vperm.xlu1 %559, %v323_v17   ;;  %v536_v17 = vld [vmem:[%s794_s5] sm:$0xff] }
  0x50   :  { %368 = vperm.xlu2 %557, %v324_v22  }
  0x56   :  { %560 = vset.pattern.permute.xlu1 %v568_v8 }
  0x5e   :  { %v110_v25 = vpop.permute.xlu2 %109 }
  0x5f   :  { %v119_v44 = vmul.f32 %v116_v38, %v110_v25 }
  0x66   :  { %v114_v28 = vpop.permute.xlu2 %113 }
  0x67   :  { %v120_v59 = vmul.f32 %v116_v38, %v114_v28 }
  0x6f   :  { %v77_v34 = vpop.permute.xlu2 %76 }
  0x70   :  { %v92_v42 = vmul.f32 %v91_v37, %v77_v34 }
  0x74   :  { %v85_v23 = vpop.permute.xlu1 %84  ;;  %v81_v24 = vpop.permute.xlu0 %80 }
  0x75   :  { %v94_v41 = vmul.f32 %v91_v37, %v85_v23  ;;  %v93_v46 = vmul.f32 %v91_v37, %v81_v24 }
  0x78   :  { %v106_v50 = vpop.permute.xlu2 %105 }
  0x79   :  { %v118_v55 = vmul.f32 %v116_v38, %v106_v50 }
  0x7c   :  { %v89_v26 = vpop.permute.xlu1 %88 }
  0x7d   :  { %v63_v27 = vpop.permute.xlu0 %62  ;;  %v95_v52 = vmul.f32 %v91_v37, %v89_v26 }
  0x7e   :  { %v73_v40 = vmul.f32 %v70_v35, %v63_v27 }
  0x80   :  { %v98_v47 = vadd.f32 %v94_v41, %v73_v40 }
  0x81   :  { %v203_v6 = vpop.permute.xlu2 %202 }
  0x82   :  { %v123_v58 = vadd.f32 %v119_v44, %v98_v47 }
  0x85   :  { %v58_v29 = vpop.permute.xlu1 %57  ;;  %v68_v31 = vpop.permute.xlu0 %67 }
  0x86   :  { %v74_v48 = vmul.f32 %v70_v35, %v68_v31  ;;  %v72_v49 = vmul.f32 %v70_v35, %v58_v29 }
  0x88   :  { %v167_v30 = vpop.f32.mrf.mxu0  ;;  %v99_v56 = vadd.f32 %v95_v52, %v74_v48  ;;  %v97_v57 = vadd.f32 %v93_v46, %v72_v49 }
  0x89   :  { %v236_v21 = vpop.permute.xlu2 %235 }
  0x8a   :  { %v122_v62 = vadd.f32 %v118_v55, %v97_v57  ;;  %v124_v63 = vadd.f32 %v120_v59, %v99_v56 }
  0x8d   :  { %v53_v39 = vpop.permute.xlu0 %52 }
  0x8e   :  { %v102_v32 = vpop.permute.xlu1 %101  ;;  %v71_v43 = vmul.f32 %v70_v35, %v53_v39  ;;  %v539_v39 = vld [vmem:[%s795_s7 + $0x8] sm:$0xff] }
  0x8f   :  { %v117_v54 = vmul.f32 %v116_v38, %v102_v32  ;;  %v538_v38 = vld [vmem:[%s795_s7] sm:$0xff] }
  0x90   :  { %v169_v36 = vpop.f32.mrf.mxu0  ;;  %v96_v53 = vadd.f32 %v92_v42, %v71_v43 }
  0x91   :  { %v178_v2 = vadd.f32 %v169_v36, %v122_v62  ;;  %v226_v29 = vpop.permute.xlu2 %225 }
  0x92   :  { %v121_v60 = vadd.f32 %v117_v54, %v96_v53 }
  0x94   :  { %v177_v3 = vadd.f32 %v167_v30, %v121_v60 }
  0x95   :  { %v188_v7 = vpop.permute.xlu0 %187 }
  0x96   :  { %v205_v10 = vadd.f32 %v188_v7, %v177_v3 }
  0x97   :  { %v198_v45 = vpop.permute.xlu1 %197 }
  0x98   :  { %v209_v15 = vmax.f32 %v205_v10, 0.0 }
  0x99   :  { %v172_v51 = vpop.f32.mrf.mxu0  ;;  %v345_v41 = vpop.permute.xlu2 %344 }
  0x9a   :  { %v179_v61 = vadd.f32 %v172_v51, %v123_v58 }
  0x9c   :  { %v207_v5 = vadd.f32 %v198_v45, %v179_v61 }
  0x9d   :  { %v231_v23 = vpop.permute.xlu0 %230 }
  0x9e   :  { %v211_v11 = vmax.f32 %v207_v5, 0.0 }
  0x9f   :  { %v193_v0 = vpop.permute.xlu1 %192 }
  0xa0   :  { %v206_v8 = vadd.f32 %v193_v0, %v178_v2 }
  0xa1   :  { %v174_v1 = vpop.f32.mrf.mxu0 }
  0xa2   :  { %v180_v4 = vadd.f32 %v174_v1, %v124_v63  ;;  %v210_v13 = vmax.f32 %v206_v8, 0.0  ;;  %v373_v43 = vpop.permute.xlu2 %372 }
  0xa4   :  { %v208_v9 = vadd.f32 %v203_v6, %v180_v4  ;;  %v213_v16 = vpack.c.bf16 %v210_v13, %v209_v15 }
  0xa5   :  { %v330_v45 = vpop.permute.xlu0 %329 }
  0xa6   :  { %v212_v12 = vmax.f32 %v208_v9, 0.0 }
  0xa7   :  { %v241_v25 = vpop.permute.xlu1 %240 }
  0xa8   :  { %v214_v14 = vpack.c.bf16 %v212_v12, %v211_v11  ;;  %v400_v12 = vld [vmem:[%s797_s10] sm:$0x7] }
  0xa9   :  { %403 = vperm.xlu1 %560, %v400_v12  }
  0xaa   :  { %265 = vmatpush.bf16.msra.mxu1 %v214_v14  ;;  %v369_v53 = vpop.permute.xlu2 %368 }
  0xae   :  { %266 = vmatpush.bf16.msra.mxu1 %v213_v16  ;;  %v377_v4 = vpop.permute.xlu0 %376 }
  0xaf   :  { %v340_v40 = vpop.permute.xlu1 %339 }
  0xb1   :  { %502 = vmatmul.msk.bf16.vlgmr.msra.gmra.mxu1 %vm151_vm0, %v536_v17 }
  0xb7   :  { %v335_v42 = vpop.permute.xlu1 %334 }
  0xc0   :  { %v365_v44 = vpop.permute.xlu1 %364 }
  0xc1   :  { %503 = vmatmul.msk.bf16.gmra.mxu1 %vm151_vm0, %v537_v18 }
 0x12e   :  { %v268_v19 = vpop.f32.mrf.mxu1 }
 0x12f   :  { %v269_v30 = vadd.f32 %v268_v19, %v226_v29 }
 0x131   :  { %v278_v36 = vmax.f32 %v269_v30, 0.0 }
 0x136   :  { %v270_v20 = vpop.f32.mrf.mxu1 }
 0x137   :  { %v271_v27 = vadd.f32 %v270_v20, %v231_v23 }
 0x139   :  { %v279_v34 = vmax.f32 %v271_v27, 0.0 }
 0x13b   :  { %v282_v37 = vpack.c.bf16 %v279_v34, %v278_v36 }
 0x13e   :  { %v273_v22 = vpop.f32.mrf.mxu1 }
 0x13f   :  { %v274_v24 = vadd.f32 %v273_v22, %v236_v21  ;;  %v399_v22 = vld [vmem:[%s798_s9] sm:$0x3] }
 0x141   :  { %v280_v31 = vmax.f32 %v274_v24, 0.0 }
 0x146   :  { %v275_v26 = vpop.f32.mrf.mxu1 }
 0x147   :  { %v276_v28 = vadd.f32 %v275_v26, %v241_v25 }
 0x149   :  { %v281_v32 = vmax.f32 %v276_v28, 0.0  ;;  %v404_v28 = vpop.permute.xlu1 %403 }
 0x14b   :  { %v283_v35 = vpack.c.bf16 %v281_v32, %v280_v31 }
 0x14d   :  { %310 = vmatpush.bf16.msra.mxu2 %v283_v35 }
 0x151   :  { %311 = vmatpush.bf16.msra.mxu2 %v282_v37 }
 0x154   :  { %512 = vmatmul.msk.bf16.vlgmr.msra.gmra.mxu2 %vm151_vm0, %v538_v38 }
 0x164   :  { %513 = vmatmul.msk.bf16.gmra.mxu2 %vm151_vm0, %v539_v39 }
 0x1d7   :  { %v313_v46 = vpop.f32.mrf.mxu2 }
 0x1d8   :  { %v347_v47 = vadd.f32 %v330_v45, %v313_v46  ;;  %v379_v48 = vadd.f32 %v365_v44, %v313_v46 }
 0x1da   :  { %v351_v49 = vmax.f32 %v347_v47, 0.0  ;;  %v383_v50 = vmax.f32 %v379_v48, 0.0 }
 0x1dc   :  { %v355_v51 = vpack.c.bf16 %v351_v49, %v351_v49  ;;  %v387_v52 = vpack.c.bf16 %v383_v50, %v383_v50 }
 0x1de   :  { %359 = vst [vmem:[%s796_s12] sm:$0xf] %v355_v51 }
 0x1df   :  { %391 = vst [vmem:[%s796_s12 + $0x4] sm:$0xf] %v387_v52  ;;  %v315_v54 = vpop.f32.mrf.mxu2 }
 0x1e0   :  { %v348_v55 = vadd.f32 %v335_v42, %v315_v54  ;;  %v380_v56 = vadd.f32 %v369_v53, %v315_v54 }
 0x1e2   :  { %v352_v57 = vmax.f32 %v348_v55, 0.0  ;;  %v384_v58 = vmax.f32 %v380_v56, 0.0 }
 0x1e4   :  { %v356_v59 = vpack.c.bf16 %v352_v57, %v352_v57  ;;  %v388_v60 = vpack.c.bf16 %v384_v58, %v384_v58 }
 0x1e5   :  { %v516_v18 = vld [vmem:[%s796_s12] sm:$0xf] }
 0x1e6   :  { %360 = vst [vmem:[%s796_s12 + $0x8] sm:$0xf] %v356_v59  ;;  %v540_v24 = vld [vmem:[%s796_s12 + $0x4] sm:$0xf] }
 0x1e7   :  { %392 = vst [vmem:[%s796_s12 + $0xc] sm:$0xf] %v388_v60  ;;  %v318_v61 = vpop.f32.mrf.mxu2 }
 0x1e8   :  { %v349_v62 = vadd.f32 %v340_v40, %v318_v61  ;;  %v381_v63 = vadd.f32 %v373_v43, %v318_v61 }
 0x1ea   :  { %v353_v0 = vmax.f32 %v349_v62, 0.0  ;;  %v385_v1 = vmax.f32 %v381_v63, 0.0 }
 0x1ec   :  { %v357_v2 = vpack.c.bf16 %v353_v0, %v353_v0  ;;  %v389_v3 = vpack.c.bf16 %v385_v1, %v385_v1 }
 0x1ed   :  { %v541_v16 = vld [vmem:[%s796_s12 + $0x4] sm:$0xf0] }
 0x1ee   :  { %361 = vst [vmem:[%s796_s12 + $0x10] sm:$0xf] %v357_v2  ;;  %v517_v19 = vor.u32 %v541_v16, %v516_v18  ;;  %v518_v23 = vld [vmem:[%s796_s12 + $0x8] sm:$0xf0] }
 0x1ef   :  { %393 = vst [vmem:[%s796_s12 + $0x14] sm:$0xf] %v389_v3  ;;  %v320_v5 = vpop.f32.mrf.mxu2  ;;  %v521_v25 = vor.u32 %v540_v24, %v518_v23 }
 0x1f0   :  { %v350_v6 = vadd.f32 %v345_v41, %v320_v5  ;;  %v382_v7 = vadd.f32 %v377_v4, %v320_v5 }
 0x1f2   :  { %v354_v8 = vmax.f32 %v350_v6, 0.0  ;;  %v386_v9 = vmax.f32 %v382_v7, 0.0 }
 0x1f4   :  { %v358_v10 = vpack.c.bf16 %v354_v8, %v354_v8  ;;  %v390_v11 = vpack.c.bf16 %v386_v9, %v386_v9 }
 0x1f5   :  { %v524_v13 = vld [vmem:[%s796_s12 + $0x10] sm:$0xf] }
 0x1f6   :  { %362 = vst [vmem:[%s796_s12 + $0x18] sm:$0xf] %v358_v10  ;;  %v542_v20 = vld [vmem:[%s796_s12 + $0x14] sm:$0xf] }
 0x1f7   :  { %394 = vst [vmem:[%s796_s12 + $0x1c] sm:$0xf] %v390_v11 }
 0x1fd   :  { %v543_v14 = vld [vmem:[%s796_s12 + $0x14] sm:$0xf0] }
 0x1fe   :  { %v525_v15 = vor.u32 %v543_v14, %v524_v13  ;;  %v526_v17 = vld [vmem:[%s796_s12 + $0x18] sm:$0xf0] }
 0x1ff   :  { %v529_v21 = vor.u32 %v542_v20, %v526_v17 }
 0x200   :  { %435 = vmatpush.bf16.msra.mxu3 %v525_v15 }
 0x204   :  { %436 = vmatpush.bf16.msra.mxu3 %v517_v19 }
 0x207   :  { %530 = vmatmul.msk.bf16.vlgmr.msra.gmra.mxu3 %vm151_vm0, %v399_v22 }
 0x208   :  { %448 = vmatpush.bf16.msrb.mxu3 %v529_v21 }
 0x20c   :  { %449 = vmatpush.bf16.msrb.mxu3 %v521_v25 }
 0x217   :  { %531 = vmatmul.msk.bf16.vlgmr.msrb.gmra.mxu3 %vm151_vm0, %v399_v22 }
 0x28a   :  { %v438_v26 = vpop.f32.mrf.mxu3 }
 0x28b   :  { %v439_v29 = vadd.f32 %v438_v26, %v404_v28 }
 0x28d   :  { %562 = vtanh.f32 %v439_v29 }
 0x292   :  { %v440_v27 = vpop.f32.mrf.mxu3 }
 0x293   :  { %v563_v32 = vpop.eup %562 }
 0x294   :  { %v457_v36 = vmul.f32 0.3, %v563_v32 }
 0x296   :  { %v459_v39 = vadd.f32 %v457_v36, %v705_v33 }
 0x29a   :  { %v451_v30 = vpop.f32.mrf.mxu3 }
 0x29b   :  { %v452_v31 = vadd.f32 %v451_v30, %v404_v28 }
 0x29d   :  { %564 = vtanh.f32 %v452_v31 }
 0x2a2   :  { %v453_v34 = vpop.f32.mrf.mxu3 }
 0x2a3   :  { %v565_v35 = vpop.eup %564 }
 0x2a4   :  { %v458_v37 = vmul.f32 0.3, %v565_v35 }
 0x2a6   :  { %v460_v38 = vadd.f32 %v458_v37, %v705_v33 }
 0x2a8   :  { %v463_v40 = vrot.slane %v460_v38, 4 }
 0x2aa   :  { %v465_v41 = vsel %vm464_vm1, %v459_v39, %v463_v40 }
 0x2ab   :  { %467 = vst [vmem:[%s799_s11] sm:$0x77] %v465_v41 }

// kernel: _lambda_.3
= control target key start
LH: loop header
LB: loop body
LE: loop exit
PB: predicated region body
PF: predicated region fallthrough
CT: control target
= control target key end

     0   :  { %v493_v0 = vmov 1   ;;  %v494_v4 = vmov 2   ;;  %vm151_vm0 = vcmask 261120   ;;  %v495_v8 = vmov 0   ;;  %s670_s2 = inlined_call_operand.vmem [shape: f32[32,3], index: 2, kind: input, shape index: {}]   ;;  %s671_s1 = inlined_call_operand.vmem [shape: bf16[32,128], index: 1, kind: input, shape index: {}]   ;;  %s672_s3 = inlined_call_operand.vmem [shape: bf16[32,32], index: 3, kind: input, shape index: {}]   ;;  %s673_s4 = inlined_call_operand.vmem [shape: f32[32,1], index: 4, kind: input, shape index: {}]   ;;  %s674_s6 = inlined_call_operand.vmem [shape: f32[32,1], index: 6, kind: input, shape index: {}]   ;;  %s675_s8 = inlined_call_operand.vmem [shape: f32[32,1], index: 8, kind: input, shape index: {}]   ;;  %s676_s10 = inlined_call_operand.vmem [shape: f32[3,1], index: 10, kind: input, shape index: {}]   ;;  %s677_s0 = inlined_call_operand.vmem [shape: f32[3,128], index: 0, kind: input, shape index: {}]   ;;  %s678_s5 = inlined_call_operand.vmem [shape: bf16[32,32], index: 5, kind: input, shape index: {}]   ;;  %s679_s7 = inlined_call_operand.vmem [shape: bf16[32,32], index: 7, kind: input, shape index: {}]   ;;  %s680_s12 = inlined_call_operand.vmem [shape: bf16[32,128], index: 12, kind: output, shape index: {1}]   ;;  %s681_s9 = inlined_call_operand.vmem [shape: bf16[3,32], index: 9, kind: input, shape index: {}]   ;;  %s682_s11 = inlined_call_operand.vmem [shape: f32[3,128], index: 11, kind: output, shape index: {0}]  }
   0x1   :  { %485 = vset.pattern.permute.xlu0 %v493_v0  ;;  %481 = vset.pattern.permute.xlu1 %v493_v0  ;;  %v48_v1 = vld [vmem:[%s670_s2 + $0x10] sm:$0xff]  ;;  %v47_v2 = vld [vmem:[%s670_s2 + $0x8] sm:$0xff]  ;;  %v457_v5 = vld [vmem:[%s671_s1] sm:$0xff] }
   0x2   :  { %v458_v3 = vld [vmem:[%s671_s1 + $0x8] sm:$0xff]  ;;  %84 = vperm.xlu1 %481, %v48_v1   ;;  %80 = vperm.xlu0 %485, %v47_v2   ;;  %v49_v6 = vld [vmem:[%s670_s2 + $0x18] sm:$0xff]  ;;  %v459_v7 = vld [vmem:[%s672_s3] sm:$0xff] }
   0x3   :  { %482 = vset.pattern.permute.xlu2 %v494_v4  ;;  %164 = vmatpush.bf16.msra.mxu0 %v458_v3  ;;  %v46_v9 = vld [vmem:[%s670_s2] sm:$0xff]  ;;  %v460_v10 = vld [vmem:[%s672_s3 + $0x8] sm:$0xff]  ;;  %v183_v12 = vld [vmem:[%s673_s4 + $0x10] sm:$0xff] }
   0x4   :  { %109 = vperm.xlu2 %482, %v48_v1   ;;  %v181_v11 = vld [vmem:[%s673_s4] sm:$0xff]  ;;  %v184_v13 = vld [vmem:[%s673_s4 + $0x18] sm:$0xff]  ;;  %v220_v14 = vld [vmem:[%s674_s6 + $0x8] sm:$0xff] }
   0x5   :  { %v182_v15 = vld [vmem:[%s673_s4 + $0x8] sm:$0xff]  ;;  %v221_v16 = vld [vmem:[%s674_s6 + $0x10] sm:$0xff]  ;;  %v288_v17 = vld [vmem:[%s675_s8] sm:$0xff] }
   0x6   :  { %v222_v18 = vld [vmem:[%s674_s6 + $0x18] sm:$0xff]  ;;  %v219_v19 = vld [vmem:[%s674_s6] sm:$0xff]  ;;  %v290_v20 = vld [vmem:[%s675_s8 + $0x10] sm:$0xff] }
   0x7   :  { %165 = vmatpush.bf16.msra.mxu0 %v457_v5  ;;  %v291_v21 = vld [vmem:[%s675_s8 + $0x18] sm:$0xff]  ;;  %v289_v22 = vld [vmem:[%s675_s8 + $0x8] sm:$0xff]  ;;  %v364_v23 = vld [vmem:[%s676_s10] sm:$0x7] }
   0x8   :  { %v629_v34 = vld [vmem:[%s677_s0] sm:$0x7] }
   0x9   :  { %v70_v36 = vperm.slane %v629_v34, 0  ;;  %v91_v38 = vperm.slane %v629_v34, 1  ;;  %v116_v39 = vperm.slane %v629_v34, 2 }
   0xa   :  { %88 = vperm.xlu1 %481, %v49_v6   ;;  %486 = vset.pattern.permute.xlu0 %v495_v8 }
   0xb   :  { %62 = vperm.xlu0 %486, %v48_v1   ;;  %426 = vmatmul.msk.bf16.vlgmr.msra.gmra.mxu0 %vm151_vm0, %v459_v7 }
   0xc   :  { %113 = vperm.xlu2 %482, %v49_v6  }
  0x12   :  { %483 = vset.pattern.permute.xlu1 %v495_v8 }
  0x13   :  { %67 = vperm.xlu0 %486, %v49_v6   ;;  %57 = vperm.xlu1 %483, %v47_v2  }
  0x14   :  { %484 = vset.pattern.permute.xlu2 %v493_v0 }
  0x15   :  { %76 = vperm.xlu2 %484, %v46_v9  }
  0x1b   :  { %487 = vset.pattern.permute.xlu1 %v494_v4  ;;  %52 = vperm.xlu0 %486, %v46_v9  }
  0x1c   :  { %427 = vmatmul.msk.bf16.gmra.mxu0 %vm151_vm0, %v460_v10  ;;  %101 = vperm.xlu1 %487, %v46_v9  }
  0x1d   :  { %488 = vset.pattern.permute.xlu2 %v494_v4 }
  0x1e   :  { %105 = vperm.xlu2 %488, %v47_v2  }
  0x23   :  { %187 = vperm.xlu0 %486, %v181_v11  }
  0x24   :  { %489 = vset.pattern.permute.xlu1 %v495_v8 }
  0x25   :  { %197 = vperm.xlu1 %489, %v183_v12  }
  0x26   :  { %490 = vset.pattern.permute.xlu2 %v495_v8 }
  0x27   :  { %202 = vperm.xlu2 %490, %v184_v13  }
  0x2b   :  { %230 = vperm.xlu0 %486, %v220_v14  }
  0x2d   :  { %192 = vperm.xlu1 %489, %v182_v15  }
  0x2f   :  { %235 = vperm.xlu2 %490, %v221_v16  }
  0x33   :  { %294 = vperm.xlu0 %486, %v288_v17  }
  0x35   :  { %240 = vperm.xlu1 %489, %v222_v18   ;;  %v461_v18 = vld [vmem:[%s678_s5] sm:$0xff] }
  0x37   :  { %225 = vperm.xlu2 %490, %v219_v19   ;;  %v462_v19 = vld [vmem:[%s678_s5 + $0x8] sm:$0xff] }
  0x3d   :  { %304 = vperm.xlu1 %489, %v290_v20  }
  0x3f   :  { %309 = vperm.xlu2 %490, %v291_v21  }
  0x45   :  { %299 = vperm.xlu1 %489, %v289_v22  }
  0x47   :  { %367 = vperm.xlu2 %490, %v364_v23  }
  0x5e   :  { %v110_v26 = vpop.permute.xlu2 %109 }
  0x5f   :  { %v119_v45 = vmul.f32 %v116_v39, %v110_v26 }
  0x66   :  { %v114_v29 = vpop.permute.xlu2 %113 }
  0x67   :  { %v120_v60 = vmul.f32 %v116_v39, %v114_v29 }
  0x6f   :  { %v77_v35 = vpop.permute.xlu2 %76 }
  0x70   :  { %v92_v42 = vmul.f32 %v91_v38, %v77_v35 }
  0x74   :  { %v85_v24 = vpop.permute.xlu1 %84  ;;  %v81_v25 = vpop.permute.xlu0 %80 }
  0x75   :  { %v94_v43 = vmul.f32 %v91_v38, %v85_v24  ;;  %v93_v47 = vmul.f32 %v91_v38, %v81_v25 }
  0x78   :  { %v106_v51 = vpop.permute.xlu2 %105 }
  0x79   :  { %v118_v56 = vmul.f32 %v116_v39, %v106_v51 }
  0x7c   :  { %v89_v27 = vpop.permute.xlu1 %88 }
  0x7d   :  { %v63_v28 = vpop.permute.xlu0 %62  ;;  %v95_v53 = vmul.f32 %v91_v38, %v89_v27 }
  0x7e   :  { %v73_v41 = vmul.f32 %v70_v36, %v63_v28 }
  0x80   :  { %v98_v48 = vadd.f32 %v94_v43, %v73_v41 }
  0x81   :  { %v203_v7 = vpop.permute.xlu2 %202 }
  0x82   :  { %v123_v59 = vadd.f32 %v119_v45, %v98_v48 }
  0x85   :  { %v58_v30 = vpop.permute.xlu1 %57  ;;  %v68_v32 = vpop.permute.xlu0 %67 }
  0x86   :  { %v74_v49 = vmul.f32 %v70_v36, %v68_v32  ;;  %v72_v50 = vmul.f32 %v70_v36, %v58_v30 }
  0x88   :  { %v167_v31 = vpop.f32.mrf.mxu0  ;;  %v99_v57 = vadd.f32 %v95_v53, %v74_v49  ;;  %v97_v58 = vadd.f32 %v93_v47, %v72_v50 }
  0x89   :  { %v236_v22 = vpop.permute.xlu2 %235 }
  0x8a   :  { %v122_v63 = vadd.f32 %v118_v56, %v97_v58  ;;  %v124_v0 = vadd.f32 %v120_v60, %v99_v57 }
  0x8d   :  { %v53_v40 = vpop.permute.xlu0 %52 }
  0x8e   :  { %v102_v33 = vpop.permute.xlu1 %101  ;;  %v71_v44 = vmul.f32 %v70_v36, %v53_v40  ;;  %v464_v40 = vld [vmem:[%s679_s7 + $0x8] sm:$0xff] }
  0x8f   :  { %v117_v55 = vmul.f32 %v116_v39, %v102_v33  ;;  %v463_v39 = vld [vmem:[%s679_s7] sm:$0xff] }
  0x90   :  { %v169_v37 = vpop.f32.mrf.mxu0  ;;  %v96_v54 = vadd.f32 %v92_v42, %v71_v44 }
  0x91   :  { %v178_v3 = vadd.f32 %v169_v37, %v122_v63  ;;  %v226_v30 = vpop.permute.xlu2 %225 }
  0x92   :  { %v121_v61 = vadd.f32 %v117_v55, %v96_v54 }
  0x94   :  { %v177_v4 = vadd.f32 %v167_v31, %v121_v61  ;;  %v363_v61 = vld [vmem:[%s681_s9] sm:$0x3] }
  0x95   :  { %v188_v8 = vpop.permute.xlu0 %187 }
  0x96   :  { %v205_v11 = vadd.f32 %v188_v8, %v177_v4 }
  0x97   :  { %v198_v46 = vpop.permute.xlu1 %197 }
  0x98   :  { %v209_v16 = vmax.f32 %v205_v11, 0.0 }
  0x99   :  { %v172_v52 = vpop.f32.mrf.mxu0  ;;  %v310_v53 = vpop.permute.xlu2 %309 }
  0x9a   :  { %v179_v62 = vadd.f32 %v172_v52, %v123_v59 }
  0x9c   :  { %v207_v6 = vadd.f32 %v198_v46, %v179_v62 }
  0x9d   :  { %v231_v24 = vpop.permute.xlu0 %230 }
  0x9e   :  { %v211_v12 = vmax.f32 %v207_v6, 0.0 }
  0x9f   :  { %v193_v1 = vpop.permute.xlu1 %192 }
  0xa0   :  { %v206_v9 = vadd.f32 %v193_v1, %v178_v3 }
  0xa1   :  { %v174_v2 = vpop.f32.mrf.mxu0  ;;  %v368_v62 = vpop.permute.xlu2 %367 }
  0xa2   :  { %v180_v5 = vadd.f32 %v174_v2, %v124_v0  ;;  %v210_v14 = vmax.f32 %v206_v9, 0.0 }
  0xa4   :  { %v208_v10 = vadd.f32 %v203_v7, %v180_v5  ;;  %v213_v17 = vpack.c.bf16 %v210_v14, %v209_v16 }
  0xa5   :  { %v295_v43 = vpop.permute.xlu0 %294 }
  0xa6   :  { %v212_v13 = vmax.f32 %v208_v10, 0.0 }
  0xa7   :  { %v241_v26 = vpop.permute.xlu1 %240 }
  0xa8   :  { %v214_v15 = vpack.c.bf16 %v212_v13, %v211_v12 }
  0xaa   :  { %265 = vmatpush.bf16.msra.mxu1 %v214_v15 }
  0xae   :  { %266 = vmatpush.bf16.msra.mxu1 %v213_v17 }
  0xaf   :  { %v305_v41 = vpop.permute.xlu1 %304 }
  0xb1   :  { %436 = vmatmul.msk.bf16.vlgmr.msra.gmra.mxu1 %vm151_vm0, %v461_v18 }
  0xb7   :  { %v300_v45 = vpop.permute.xlu1 %299 }
  0xc1   :  { %437 = vmatmul.msk.bf16.gmra.mxu1 %vm151_vm0, %v462_v19 }
 0x12e   :  { %v268_v20 = vpop.f32.mrf.mxu1 }
 0x12f   :  { %v269_v31 = vadd.f32 %v268_v20, %v226_v30 }
 0x131   :  { %v278_v37 = vmax.f32 %v269_v31, 0.0 }
 0x136   :  { %v270_v21 = vpop.f32.mrf.mxu1 }
 0x137   :  { %v271_v28 = vadd.f32 %v270_v21, %v231_v24 }
 0x139   :  { %v279_v35 = vmax.f32 %v271_v28, 0.0 }
 0x13b   :  { %v282_v38 = vpack.c.bf16 %v279_v35, %v278_v37 }
 0x13e   :  { %v273_v23 = vpop.f32.mrf.mxu1 }
 0x13f   :  { %v274_v25 = vadd.f32 %v273_v23, %v236_v22 }
 0x141   :  { %v280_v32 = vmax.f32 %v274_v25, 0.0 }
 0x146   :  { %v275_v27 = vpop.f32.mrf.mxu1 }
 0x147   :  { %v276_v29 = vadd.f32 %v275_v27, %v241_v26 }
 0x149   :  { %v281_v33 = vmax.f32 %v276_v29, 0.0 }
 0x14b   :  { %v283_v36 = vpack.c.bf16 %v281_v33, %v280_v32 }
 0x14d   :  { %334 = vmatpush.bf16.msra.mxu2 %v283_v36 }
 0x151   :  { %335 = vmatpush.bf16.msra.mxu2 %v282_v38 }
 0x154   :  { %446 = vmatmul.msk.bf16.vlgmr.msra.gmra.mxu2 %vm151_vm0, %v463_v39 }
 0x164   :  { %447 = vmatmul.msk.bf16.gmra.mxu2 %vm151_vm0, %v464_v40 }
 0x1d7   :  { %v337_v42 = vpop.f32.mrf.mxu2 }
 0x1d8   :  { %v338_v44 = vadd.f32 %v337_v42, %v295_v43 }
 0x1da   :  { %v347_v48 = vmax.f32 %v338_v44, 0.0 }
 0x1df   :  { %v339_v46 = vpop.f32.mrf.mxu2 }
 0x1e0   :  { %v340_v47 = vadd.f32 %v339_v46, %v300_v45 }
 0x1e2   :  { %v348_v49 = vmax.f32 %v340_v47, 0.0 }
 0x1e4   :  { %v470_v50 = vpack.c.bf16 %v348_v49, %v347_v48 }
 0x1e6   :  { %471 = vst [vmem:[%s680_s12] sm:$0xff] %v470_v50  }
 0x1e7   :  { %v342_v51 = vpop.f32.mrf.mxu2 }
 0x1e8   :  { %v343_v52 = vadd.f32 %v342_v51, %v305_v41 }
 0x1ea   :  { %v349_v56 = vmax.f32 %v343_v52, 0.0 }
 0x1ed   :  { %v465_v60 = vld [vmem:[%s680_s12] sm:$0xff] }
 0x1ef   :  { %v344_v54 = vpop.f32.mrf.mxu2 }
 0x1f0   :  { %v345_v55 = vadd.f32 %v344_v54, %v310_v53 }
 0x1f2   :  { %v350_v57 = vmax.f32 %v345_v55, 0.0 }
 0x1f4   :  { %v475_v58 = vpack.c.bf16 %v350_v57, %v349_v56 }
 0x1f6   :  { %477 = vst [vmem:[%s680_s12 + $0x8] sm:$0xff] %v475_v58  }
 0x1fd   :  { %v466_v59 = vld [vmem:[%s680_s12 + $0x8] sm:$0xff] }
 0x1fe   :  { %391 = vmatpush.bf16.msra.mxu3 %v466_v59 }
 0x202   :  { %392 = vmatpush.bf16.msra.mxu3 %v465_v60 }
 0x205   :  { %456 = vmatmul.msk.bf16.vlgmr.msra.gmra.mxu3 %vm151_vm0, %v363_v61 }
 0x288   :  { %v394_v63 = vpop.f32.mrf.mxu3 }
 0x289   :  { %v395_v0 = vadd.f32 %v394_v63, %v368_v62 }
 0x28b   :  { %491 = vtanh.f32 %v395_v0 }
 0x290   :  { %v396_v1 = vpop.f32.mrf.mxu3 }
 0x291   :  { %v492_v2 = vpop.eup %491 }
 0x292   :  { %v399_v3 = vmul.f32 0.4, %v492_v2 }
 0x294   :  { %v400_v4 = vadd.f32 %v399_v3, %v629_v34 }
 0x296   :  { %401 = vst [vmem:[%s682_s11] sm:$0x7] %v400_v4 }

// kernel: _lambda_.5
= control target key start
LH: loop header
LB: loop body
LE: loop exit
PB: predicated region body
PF: predicated region fallthrough
CT: control target
= control target key end

     0   :  { %v1681_v3 = vmov 1   ;;  %v1682_v15 = vmov 2   ;;  %s2134_s0 = inlined_call_operand.vmem [shape: f32[3,256], index: 0, kind: input, shape index: {}]   ;;  %s2135_s1 = inlined_call_operand.vmem [shape: bf16[32,256], index: 1, kind: input, shape index: {}]   ;;  %s2136_s2 = inlined_call_operand.vmem [shape: f32[32,3], index: 2, kind: input, shape index: {}]   ;;  %s2137_s3 = inlined_call_operand.vmem [shape: bf16[32,32], index: 3, kind: input, shape index: {}]   ;;  %s2138_s4 = inlined_call_operand.vmem [shape: f32[32,1], index: 4, kind: input, shape index: {}]   ;;  %s2139_s5 = inlined_call_operand.vmem [shape: bf16[32,32], index: 5, kind: input, shape index: {}]   ;;  %s2140_s6 = inlined_call_operand.vmem [shape: f32[32,1], index: 6, kind: input, shape index: {}]   ;;  %s2141_s7 = inlined_call_operand.vmem [shape: bf16[32,32], index: 7, kind: input, shape index: {}]   ;;  %s2142_s8 = inlined_call_operand.vmem [shape: f32[32,8], index: 8, kind: input, shape index: {}]   ;;  %s2143_s9 = inlined_call_operand.vmem [shape: bf16[3,32], index: 9, kind: input, shape index: {}]   ;;  %s2144_s10 = inlined_call_operand.vmem [shape: f32[3,1], index: 10, kind: input, shape index: {}]   ;;  %s2145_s11 = inlined_call_operand.vmem [shape: f32[3,2048], index: 11, kind: output, shape index: {0}]   ;;  %s2146_s12 = inlined_call_operand.hbm [shape: bf16[32,2048], index: 12, kind: output, shape index: {1}]  }
   0x1   :  { %v49_v0 = vld [vmem:[%s2136_s2 + $0x10] sm:$0xff]  ;;  %v48_v1 = vld [vmem:[%s2136_s2 + $0x8] sm:$0xff]  ;;  %1595 = vset.pattern.permute.xlu0 %v1681_v3  ;;  %1591 = vset.pattern.permute.xlu1 %v1681_v3  ;;  %v1541_v4 = vld [vmem:[%s2135_s1 + $0x14] sm:$0xf0] }
   0x2   :  { %v1360_v2 = vld [vmem:[%s2135_s1 + $0x10] sm:$0xf]  ;;  %v1540_v5 = vld [vmem:[%s2135_s1 + $0x14] sm:$0xf]  ;;  %v1362_v6 = vld [vmem:[%s2135_s1 + $0x18] sm:$0xf0]  ;;  %95 = vperm.xlu1 %1591, %v49_v0   ;;  %91 = vperm.xlu0 %1595, %v48_v1  }
   0x3   :  { %v1361_v7 = vor.u32 %v1541_v4, %v1360_v2  ;;  %v1365_v8 = vor.u32 %v1540_v5, %v1362_v6  ;;  %v1352_v9 = vld [vmem:[%s2135_s1] sm:$0xf]  ;;  %v1539_v10 = vld [vmem:[%s2135_s1 + $0x4] sm:$0xf0]  ;;  %v1538_v11 = vld [vmem:[%s2135_s1 + $0x4] sm:$0xf]  ;;  %1592 = vset.pattern.permute.xlu2 %v1682_v15 }
   0x4   :  { %v1354_v12 = vld [vmem:[%s2135_s1 + $0x8] sm:$0xf0]  ;;  %v1353_v13 = vor.u32 %v1539_v10, %v1352_v9 }
   0x5   :  { %209 = vmatpush.bf16.msra.mxu0 %v1361_v7  ;;  %228 = vmatpush.bf16.msra.mxu1 %v1365_v8  ;;  %v1357_v14 = vor.u32 %v1538_v11, %v1354_v12 }
   0x6   :  { %18 = vsyncpa [#allocation3], 0  ;;  %133 = vperm.xlu2 %1592, %v49_v0   ;;  %v50_v16 = vld [vmem:[%s2136_s2 + $0x18] sm:$0xff]  ;;  %v1542_v17 = vld [vmem:[%s2137_s3] sm:$0xff]  ;;  %vm196_vm0 = vcmask 261120   ;;  %v1683_v18 = vmov 0  }
   0x7   :  { %v47_v19 = vld [vmem:[%s2136_s2] sm:$0xff]  ;;  %v1543_v20 = vld [vmem:[%s2137_s3 + $0x8] sm:$0xff]  ;;  %v251_v22 = vld [vmem:[%s2138_s4 + $0x10] sm:$0xff]  ;;  %s1328_s21 = sshll.u32 %s2146_s12, 4  ;;  %s1689_s22 = smov [#allocation2]   ;;  %vm1295_vm1 = vcmask 1043456   ;;  %s1329_s21 = int_to_ptr.hbm [resolvable:$true] %s1328_s21 }
   0x8   :  { %v249_v21 = vld [vmem:[%s2138_s4] sm:$0xff]  ;;  %v252_v23 = vld [vmem:[%s2138_s4 + $0x18] sm:$0xff]  ;;  %v298_v24 = vld [vmem:[%s2140_s6 + $0x8] sm:$0xff]  ;;  %s1326_s23 = sshll.u32 %s1689_s22, 4  ;;  %s1690_s24 = smov 1024   ;;  %s1327_s23 = int_to_ptr.vmem [resolvable:$true] %s1326_s23 }
   0x9   :  { %210 = vmatpush.bf16.msra.mxu0 %v1353_v13  ;;  %229 = vmatpush.bf16.msra.mxu1 %v1357_v14  ;;  %v250_v25 = vld [vmem:[%s2138_s4 + $0x8] sm:$0xff]  ;;  %v299_v26 = vld [vmem:[%s2140_s6 + $0x10] sm:$0xff]  ;;  %v1834_v27 = vld [vmem:[%s2142_s8] sm:$0xff]  ;;  %s1691_s25 = smov 64  }
   0xa   :  { %99 = vperm.xlu1 %1591, %v50_v16   ;;  %1596 = vset.pattern.permute.xlu0 %v1683_v18  ;;  %v300_v28 = vld [vmem:[%s2140_s6 + $0x18] sm:$0xff]  ;;  %v297_v29 = vld [vmem:[%s2140_s6] sm:$0xff]  ;;  %v1846_v30 = vld [vmem:[%s2142_s8 + $0x10] sm:$0xff] }
   0xb   :  { %63 = vperm.xlu0 %1596, %v49_v0   ;;  %v1851_v31 = vld [vmem:[%s2142_s8 + $0x18] sm:$0xff]  ;;  %v1859_v32 = vld [vmem:[%s2134_s0] sm:$0x77]  ;;  %v1866_v33 = vld [vmem:[%s2142_s8 + $0x8] sm:$0xff] }
   0xc   :  { %1366 = vmatmul.msk.bf16.vlgmr.msra.gmra.mxu0 %vm196_vm0, %v1542_v17  ;;  %1368 = vmatmul.msk.bf16.vlgmr.msra.gmra.mxu1 %vm196_vm0, %v1542_v17  ;;  %1199 = vst [vmem:[#allocation1] ss:$2 sm:$0xff] %v1859_v32  ;;  %v72_v44 = vperm.slane %v1859_v32, 0  ;;  %v73_v45 = vperm.slane %v1859_v32, 4  ;;  %v102_v46 = vperm.slane %v1859_v32, 1  ;;  %v103_v47 = vperm.slane %v1859_v32, 5 }
   0xd   :  { %v140_v49 = vperm.slane %v1859_v32, 2  ;;  %v141_v50 = vperm.slane %v1859_v32, 6 }
   0xe   :  { %137 = vperm.xlu2 %1592, %v50_v16   ;;  %v76_v51 = vperm.slane %v72_v44, 0  ;;  %v77_v53 = vperm.slane %v73_v45, 0  ;;  %v106_v56 = vperm.slane %v102_v46, 1  ;;  %v107_v57 = vperm.slane %v103_v47, 1 }
   0xf   :  { %v144_v59 = vperm.slane %v140_v49, 2  ;;  %v145_v60 = vperm.slane %v141_v50, 2 }
  0x12   :  { %1593 = vset.pattern.permute.xlu1 %v1683_v18 }
  0x13   :  { %58 = vperm.xlu1 %1593, %v48_v1   ;;  %68 = vperm.xlu0 %1596, %v50_v16  }
  0x16   :  { %1594 = vset.pattern.permute.xlu2 %v1681_v3 }
  0x17   :  { %87 = vperm.xlu2 %1594, %v47_v19  }
  0x1b   :  { %1597 = vset.pattern.permute.xlu1 %v1682_v15  ;;  %53 = vperm.xlu0 %1596, %v47_v19  }
  0x1c   :  { %1367 = vmatmul.msk.bf16.gmra.mxu0 %vm196_vm0, %v1543_v20  ;;  %1369 = vmatmul.msk.bf16.gmra.mxu1 %vm196_vm0, %v1543_v20 }
  0x1d   :  { %125 = vperm.xlu1 %1597, %v47_v19  }
  0x1f   :  { %1598 = vset.pattern.permute.xlu2 %v1682_v15 }
  0x20   :  { %129 = vperm.xlu2 %1598, %v48_v1  }
  0x23   :  { %255 = vperm.xlu0 %1596, %v249_v21  }
  0x25   :  { %1599 = vset.pattern.permute.xlu1 %v1683_v18 }
  0x26   :  { %265 = vperm.xlu1 %1599, %v251_v22  }
  0x28   :  { %1600 = vset.pattern.permute.xlu2 %v1683_v18 }
  0x29   :  { %270 = vperm.xlu2 %1600, %v252_v23  }
  0x2b   :  { %308 = vperm.xlu0 %1596, %v298_v24  }
  0x2e   :  { %260 = vperm.xlu1 %1599, %v250_v25  }
  0x31   :  { %313 = vperm.xlu2 %1600, %v299_v26  }
  0x33   :  { %451 = vperm.xlu0 %1596, %v1834_v27  }
  0x36   :  { %318 = vperm.xlu1 %1599, %v300_v28  }
  0x39   :  { %303 = vperm.xlu2 %1600, %v297_v29  }
  0x3b   :  { %1602 = vset.pattern.permute.xlu0 %v1681_v3 }
  0x3c   :  { %506 = vperm.xlu0 %1602, %v1851_v31  }
  0x3e   :  { %461 = vperm.xlu1 %1599, %v1846_v30  }
  0x41   :  { %466 = vperm.xlu2 %1600, %v1851_v31  }
  0x46   :  { %456 = vperm.xlu1 %1599, %v1866_v33  }
  0x49   :  { %1601 = vset.pattern.permute.xlu2 %v1681_v3 }
  0x4a   :  { %502 = vperm.xlu2 %1601, %v1846_v30  }
  0x4e   :  { %1603 = vset.pattern.permute.xlu1 %v1681_v3 }
  0x4f   :  { %494 = vperm.xlu1 %1603, %v1834_v27  }
  0x52   :  { %498 = vperm.xlu2 %1601, %v1866_v33  }
  0x60   :  { %v134_v36 = vpop.permute.xlu2 %133 }
  0x61   :  { %v150_v9 = vmul.f32 %v144_v59, %v134_v36  ;;  %v151_v10 = vmul.f32 %v145_v60, %v134_v36 }
  0x68   :  { %v138_v39 = vpop.permute.xlu2 %137 }
  0x69   :  { %v152_v45 = vmul.f32 %v144_v59, %v138_v39  ;;  %v153_v46 = vmul.f32 %v145_v60, %v138_v39 }
  0x71   :  { %v88_v48 = vpop.permute.xlu2 %87 }
  0x72   :  { %v108_v62 = vmul.f32 %v106_v56, %v88_v48  ;;  %v109_v63 = vmul.f32 %v107_v57, %v88_v48 }
  0x74   :  { %v96_v34 = vpop.permute.xlu1 %95  ;;  %v92_v35 = vpop.permute.xlu0 %91 }
  0x75   :  { %v112_v1 = vmul.f32 %v106_v56, %v96_v34  ;;  %v113_v2 = vmul.f32 %v107_v57, %v96_v34  ;;  %v110_v3 = vmul.f32 %v106_v56, %v92_v35  ;;  %v111_v5 = vmul.f32 %v107_v57, %v92_v35 }
  0x7a   :  { %v130_v12 = vpop.permute.xlu2 %129 }
  0x7b   :  { %v148_v16 = vmul.f32 %v144_v59, %v130_v12  ;;  %v149_v17 = vmul.f32 %v145_v60, %v130_v12 }
  0x7c   :  { %v100_v37 = vpop.permute.xlu1 %99 }
  0x7d   :  { %v64_v38 = vpop.permute.xlu0 %63  ;;  %v114_v22 = vmul.f32 %v106_v56, %v100_v37  ;;  %v115_v23 = vmul.f32 %v107_v57, %v100_v37 }
  0x7e   :  { %v82_v61 = vmul.f32 %v76_v51, %v64_v38  ;;  %v83_v0 = vmul.f32 %v77_v53, %v64_v38 }
  0x80   :  { %v120_v11 = vadd.f32 %v112_v1, %v82_v61  ;;  %v121_v14 = vadd.f32 %v113_v2, %v83_v0 }
  0x82   :  { %v158_v36 = vadd.f32 %v150_v9, %v120_v11  ;;  %v159_v44 = vadd.f32 %v151_v10, %v121_v14 }
  0x83   :  { %v271_v1 = vpop.permute.xlu2 %270 }
  0x85   :  { %v69_v40 = vpop.permute.xlu0 %68  ;;  %v59_v41 = vpop.permute.xlu1 %58 }
  0x86   :  { %v80_v6 = vmul.f32 %v76_v51, %v59_v41  ;;  %v81_v7 = vmul.f32 %v77_v53, %v59_v41  ;;  %v84_v13 = vmul.f32 %v76_v51, %v69_v40  ;;  %v85_v19 = vmul.f32 %v77_v53, %v69_v40 }
  0x88   :  { %v118_v28 = vadd.f32 %v110_v3, %v80_v6  ;;  %v119_v29 = vadd.f32 %v111_v5, %v81_v7  ;;  %v122_v38 = vadd.f32 %v114_v22, %v84_v13  ;;  %v123_v41 = vadd.f32 %v115_v23, %v85_v19 }
  0x89   :  { %v1874_v42 = vpop.f32.mrf.mxu0  ;;  %v1876_v43 = vpop.f32.mrf.mxu1  ;;  %v1684_v3 = vmov 3   ;;  %v1685_v22 = vmov 5  }
  0x8a   :  { %v156_v49 = vadd.f32 %v148_v16, %v118_v28  ;;  %v157_v50 = vadd.f32 %v149_v17, %v119_v29  ;;  %v160_v37 = vadd.f32 %v152_v45, %v122_v38  ;;  %v161_v61 = vadd.f32 %v153_v46, %v123_v41  ;;  %1604 = vset.pattern.permute.xlu1 %v1684_v3 }
  0x8b   :  { %1606 = vset.pattern.permute.xlu0 %v1684_v3  ;;  %582 = vperm.xlu1 %1604, %v1846_v30   ;;  %v314_v29 = vpop.permute.xlu2 %313  ;;  %v1688_v38 = vmov 6  }
  0x8c   :  { %574 = vperm.xlu0 %1606, %v1834_v27   ;;  %1605 = vset.pattern.permute.xlu2 %v1684_v3 }
  0x8d   :  { %v54_v58 = vpop.permute.xlu0 %53  ;;  %586 = vperm.xlu2 %1605, %v1851_v31  }
  0x8e   :  { %v78_v4 = vmul.f32 %v76_v51, %v54_v58  ;;  %v79_v8 = vmul.f32 %v77_v53, %v54_v58 }
  0x8f   :  { %v126_v52 = vpop.permute.xlu1 %125 }
  0x90   :  { %v116_v24 = vadd.f32 %v108_v62, %v78_v4  ;;  %v146_v25 = vmul.f32 %v144_v59, %v126_v52  ;;  %v117_v34 = vadd.f32 %v109_v63, %v79_v8  ;;  %v147_v35 = vmul.f32 %v145_v60, %v126_v52 }
  0x91   :  { %v214_v54 = vpop.f32.mrf.mxu0  ;;  %v233_v55 = vpop.f32.mrf.mxu1 }
  0x92   :  { %v154_v47 = vadd.f32 %v146_v25, %v116_v24  ;;  %v155_v40 = vadd.f32 %v147_v35, %v117_v34  ;;  %v243_v53 = vadd.f32 %v214_v54, %v156_v49  ;;  %v244_v56 = vadd.f32 %v233_v55, %v157_v50 }
  0x93   :  { %578 = vperm.xlu1 %1604, %v1866_v33   ;;  %v304_v49 = vpop.permute.xlu2 %303 }
  0x94   :  { %v241_v52 = vadd.f32 %v1874_v42, %v154_v47  ;;  %v242_v39 = vadd.f32 %v1876_v43, %v155_v40  ;;  %1609 = vset.pattern.permute.xlu0 %v1682_v15 }
  0x95   :  { %v256_v59 = vpop.permute.xlu0 %255  ;;  %538 = vperm.xlu0 %1609, %v1866_v33   ;;  %1607 = vset.pattern.permute.xlu2 %v1682_v15 }
  0x96   :  { %v273_v5 = vadd.f32 %v256_v59, %v241_v52  ;;  %v274_v43 = vadd.f32 %v256_v59, %v242_v39  ;;  %542 = vperm.xlu2 %1607, %v1846_v30   ;;  %v1546_v59 = vld [vmem:[%s2141_s7] sm:$0xff] }
  0x98   :  { %v266_v20 = vpop.permute.xlu1 %265  ;;  %v281_v14 = vmax.f32 %v273_v5, 0.0  ;;  %v282_v16 = vmax.f32 %v274_v43, 0.0 }
  0x99   :  { %v217_v21 = vpop.f32.mrf.mxu0  ;;  %v236_v26 = vpop.f32.mrf.mxu1 }
  0x9a   :  { %v245_v48 = vadd.f32 %v217_v21, %v158_v36  ;;  %v246_v51 = vadd.f32 %v236_v26, %v159_v44  ;;  %v1545_v21 = vld [vmem:[%s2139_s5 + $0x8] sm:$0xff]  ;;  %v1687_v26 = vmov 7  }
  0x9b   :  { %1608 = vset.pattern.permute.xlu1 %v1682_v15  ;;  %v1686_v15 = vmov 4   ;;  %v1939_v3 = vpop.permute.xlu2 %466 }
  0x9c   :  { %v277_v0 = vadd.f32 %v266_v20, %v245_v48  ;;  %v278_v2 = vadd.f32 %v266_v20, %v246_v51  ;;  %v1544_v20 = vld [vmem:[%s2139_s5] sm:$0xff]  ;;  %546 = vperm.xlu1 %1608, %v1851_v31  }
  0x9d   :  { %1612 = vset.pattern.permute.xlu0 %v1686_v15  ;;  %v309_v36 = vpop.permute.xlu0 %308 }
  0x9e   :  { %v285_v6 = vmax.f32 %v277_v0, 0.0  ;;  %v286_v8 = vmax.f32 %v278_v2, 0.0  ;;  %534 = vperm.xlu2 %1607, %v1834_v27   ;;  %622 = vperm.xlu0 %1612, %v1846_v30  }
  0xa0   :  { %v261_v57 = vpop.permute.xlu1 %260 }
  0xa1   :  { %v219_v58 = vpop.f32.mrf.mxu0  ;;  %v238_v63 = vpop.f32.mrf.mxu1  ;;  %v275_v4 = vadd.f32 %v261_v57, %v243_v53  ;;  %v276_v55 = vadd.f32 %v261_v57, %v244_v56 }
  0xa2   :  { %v247_v62 = vadd.f32 %v219_v58, %v160_v37  ;;  %v248_v60 = vadd.f32 %v238_v63, %v161_v61 }
  0xa3   :  { %v283_v10 = vmax.f32 %v275_v4, 0.0  ;;  %v284_v12 = vmax.f32 %v276_v55, 0.0 }
  0xa4   :  { %v279_v54 = vadd.f32 %v271_v1, %v247_v62  ;;  %v280_v42 = vadd.f32 %v271_v1, %v248_v60  ;;  %1610 = vset.pattern.permute.xlu1 %v1685_v22 }
  0xa5   :  { %v289_v17 = vpack.c.bf16 %v283_v10, %v281_v14  ;;  %v290_v19 = vpack.c.bf16 %v284_v12, %v282_v16  ;;  %662 = vperm.xlu1 %1610, %v1846_v30  }
  0xa6   :  { %v287_v7 = vmax.f32 %v279_v54, 0.0  ;;  %v288_v9 = vmax.f32 %v280_v42, 0.0  ;;  %1611 = vset.pattern.permute.xlu2 %v1685_v22  ;;  %1616 = vset.pattern.permute.xlu0 %v1687_v26 }
  0xa7   :  { %666 = vperm.xlu2 %1611, %v1851_v31   ;;  %746 = vperm.xlu0 %1616, %v1851_v31  }
  0xa8   :  { %v291_v11 = vpack.c.bf16 %v287_v7, %v285_v6  ;;  %v292_v13 = vpack.c.bf16 %v288_v9, %v286_v8  ;;  %v319_v44 = vpop.permute.xlu1 %318  ;;  %v452_v6 = vpop.permute.xlu0 %451 }
  0xaa   :  { %343 = vmatpush.bf16.msra.mxu2 %v291_v11  ;;  %362 = vmatpush.bf16.msra.mxu3 %v292_v13 }
  0xad   :  { %654 = vperm.xlu1 %1610, %v1834_v27  }
  0xae   :  { %344 = vmatpush.bf16.msra.mxu2 %v289_v17  ;;  %363 = vmatpush.bf16.msra.mxu3 %v290_v19 }
  0xaf   :  { %658 = vperm.xlu2 %1611, %v1866_v33   ;;  %1620 = vset.pattern.permute.xlu0 %v1688_v38 }
  0xb0   :  { %694 = vperm.xlu0 %1620, %v1834_v27   ;;  %v1933_v39 = vpop.permute.xlu1 %461  ;;  %v1957_v8 = vpop.permute.xlu0 %506 }
  0xb1   :  { %1378 = vmatmul.msk.bf16.vlgmr.msra.gmra.mxu2 %vm196_vm0, %v1544_v20  ;;  %1380 = vmatmul.msk.bf16.vlgmr.msra.gmra.mxu3 %vm196_vm0, %v1544_v20 }
  0xb5   :  { %1613 = vset.pattern.permute.xlu1 %v1686_v15 }
  0xb6   :  { %626 = vperm.xlu1 %1613, %v1851_v31  }
  0xb7   :  { %1614 = vset.pattern.permute.xlu2 %v1686_v15 }
  0xb8   :  { %614 = vperm.xlu2 %1614, %v1834_v27   ;;  %1622 = vset.pattern.permute.xlu0 %v1683_v18  ;;  %v1937_v60 = vpop.permute.xlu1 %456 }
  0xbe   :  { %618 = vperm.xlu1 %1613, %v1866_v33  }
  0xc0   :  { %1615 = vset.pattern.permute.xlu2 %v1687_v26 }
  0xc1   :  { %1379 = vmatmul.msk.bf16.gmra.mxu2 %vm196_vm0, %v1545_v21  ;;  %1381 = vmatmul.msk.bf16.gmra.mxu3 %vm196_vm0, %v1545_v21  ;;  %v495_v2 = vpop.permute.xlu1 %494 }
  0xc2   :  { %742 = vperm.xlu2 %1615, %v1846_v30  }
  0xc6   :  { %1617 = vset.pattern.permute.xlu1 %v1687_v26 }
  0xc7   :  { %734 = vperm.xlu1 %1617, %v1834_v27  }
  0xca   :  { %738 = vperm.xlu2 %1615, %v1866_v33  }
  0xcf   :  { %1618 = vset.pattern.permute.xlu1 %v1688_v38 }
  0xd0   :  { %702 = vperm.xlu1 %1618, %v1846_v30  }
  0xd2   :  { %1619 = vset.pattern.permute.xlu2 %v1688_v38 }
  0xd3   :  { %706 = vperm.xlu2 %1619, %v1851_v31   ;;  %v1547_v31 = vld [vmem:[%s2141_s7 + $0x8] sm:$0xff] }
  0xd8   :  { %698 = vperm.xlu1 %1618, %v1866_v33  }
  0xdb   :  { %1621 = vset.pattern.permute.xlu2 %v1683_v18  ;;  %v1941_v18 = vpop.permute.xlu2 %502 }
  0xe3   :  { %v1945_v54 = vpop.permute.xlu2 %498 }
  0xeb   :  { %v1949_v42 = vpop.permute.xlu2 %586 }
  0xf3   :  { %v1953_v7 = vpop.permute.xlu2 %542 }
  0xfb   :  { %v535_v9 = vpop.permute.xlu2 %534 }
  0xfd   :  { %v1943_v4 = vpop.permute.xlu1 %582 }
  0xfe   :  { %v575_v11 = vpop.permute.xlu0 %574 }
 0x103   :  { %v1959_v12 = vpop.permute.xlu2 %666 }
 0x105   :  { %v1947_v55 = vpop.permute.xlu1 %578 }
 0x107   :  { %v1963_v14 = vpop.permute.xlu0 %538 }
 0x10b   :  { %v1965_v16 = vpop.permute.xlu2 %658 }
 0x10e   :  { %v1951_v5 = vpop.permute.xlu1 %546 }
 0x110   :  { %v1969_v19 = vpop.permute.xlu0 %622 }
 0x113   :  { %v615_v20 = vpop.permute.xlu2 %614 }
 0x117   :  { %v1955_v43 = vpop.permute.xlu1 %662 }
 0x119   :  { %v1971_v22 = vpop.permute.xlu0 %746 }
 0x11c   :  { %v1973_v15 = vpop.permute.xlu2 %742 }
 0x11f   :  { %v655_v10 = vpop.permute.xlu1 %654 }
 0x128   :  { %v1961_v13 = vpop.permute.xlu1 %626 }
 0x130   :  { %v1967_v17 = vpop.permute.xlu1 %618 }
 0x134   :  { %v346_v23 = vpop.f32.mrf.mxu2  ;;  %v365_v24 = vpop.f32.mrf.mxu3 }
 0x135   :  { %v347_v30 = vadd.f32 %v346_v23, %v304_v49  ;;  %v366_v53 = vadd.f32 %v365_v24, %v304_v49  ;;  %v695_v24 = vpop.permute.xlu0 %694 }
 0x137   :  { %v375_v63 = vmax.f32 %v347_v30, 0.0  ;;  %v376_v0 = vmax.f32 %v366_v53, 0.0 }
 0x139   :  { %v735_v21 = vpop.permute.xlu1 %734 }
 0x13c   :  { %v348_v25 = vpop.f32.mrf.mxu2  ;;  %v367_v28 = vpop.f32.mrf.mxu3 }
 0x13d   :  { %v349_v47 = vadd.f32 %v348_v25, %v309_v36  ;;  %v368_v50 = vadd.f32 %v367_v28, %v309_v36 }
 0x13f   :  { %v377_v58 = vmax.f32 %v349_v47, 0.0  ;;  %v378_v52 = vmax.f32 %v368_v50, 0.0 }
 0x141   :  { %v383_v33 = vpack.c.bf16 %v377_v58, %v375_v63  ;;  %v384_v1 = vpack.c.bf16 %v378_v52, %v376_v0 }
 0x142   :  { %v1975_v23 = vpop.permute.xlu1 %702 }
 0x144   :  { %v351_v34 = vpop.f32.mrf.mxu2  ;;  %v370_v35 = vpop.f32.mrf.mxu3 }
 0x145   :  { %v352_v41 = vadd.f32 %v351_v34, %v314_v29  ;;  %v371_v45 = vadd.f32 %v370_v35, %v314_v29 }
 0x147   :  { %v379_v37 = vmax.f32 %v352_v41, 0.0  ;;  %v380_v56 = vmax.f32 %v371_v45, 0.0 }
 0x14c   :  { %v353_v46 = vpop.f32.mrf.mxu2  ;;  %v372_v40 = vpop.f32.mrf.mxu3 }
 0x14d   :  { %v354_v48 = vadd.f32 %v353_v46, %v319_v44  ;;  %v373_v51 = vadd.f32 %v372_v40, %v319_v44 }
 0x14f   :  { %v381_v27 = vmax.f32 %v354_v48, 0.0  ;;  %v382_v57 = vmax.f32 %v373_v51, 0.0 }
 0x151   :  { %v385_v61 = vpack.c.bf16 %v381_v27, %v379_v37  ;;  %v386_v62 = vpack.c.bf16 %v382_v57, %v380_v56 }
 0x153   :  { %413 = vmatpush.bf16.msrb.mxu0 %v385_v61  ;;  %432 = vmatpush.bf16.msrb.mxu1 %v386_v62 }
 0x157   :  { %414 = vmatpush.bf16.msrb.mxu0 %v383_v33  ;;  %433 = vmatpush.bf16.msrb.mxu1 %v384_v1 }
 0x15a   :  { %1390 = vmatmul.msk.bf16.vlgmr.msrb.gmra.mxu0 %vm196_vm0, %v1546_v59  ;;  %1392 = vmatmul.msk.bf16.vlgmr.msrb.gmra.mxu1 %vm196_vm0, %v1546_v59 }
 0x16a   :  { %1391 = vmatmul.msk.bf16.gmra.mxu0 %vm196_vm0, %v1547_v31  ;;  %1393 = vmatmul.msk.bf16.gmra.mxu1 %vm196_vm0, %v1547_v31 }
 0x1d7   :  { %v416_v25 = vpop.f32.mrf.mxu0  ;;  %v435_v44 = vpop.f32.mrf.mxu1 }
 0x1d8   :  { %v469_v26 = vadd.f32 %v452_v6, %v416_v25  ;;  %v509_v28 = vadd.f32 %v495_v2, %v416_v25  ;;  %v549_v29 = vadd.f32 %v535_v9, %v416_v25  ;;  %v589_v34 = vadd.f32 %v575_v11, %v416_v25 }
 0x1d9   :  { %v629_v35 = vadd.f32 %v615_v20, %v416_v25  ;;  %v669_v38 = vadd.f32 %v655_v10, %v416_v25  ;;  %v709_v36 = vadd.f32 %v695_v24, %v416_v25  ;;  %v749_v41 = vadd.f32 %v735_v21, %v416_v25 }
 0x1da   :  { %v477_v45 = vmax.f32 %v469_v26, 0.0  ;;  %v517_v46 = vmax.f32 %v509_v28, 0.0  ;;  %v557_v47 = vmax.f32 %v549_v29, 0.0  ;;  %v597_v48 = vmax.f32 %v589_v34, 0.0 }
 0x1db   :  { %v637_v40 = vmax.f32 %v629_v35, 0.0  ;;  %v677_v49 = vmax.f32 %v669_v38, 0.0  ;;  %v717_v50 = vmax.f32 %v709_v36, 0.0  ;;  %v757_v51 = vmax.f32 %v749_v41, 0.0 }
 0x1dc   :  { %v470_v30 = vadd.f32 %v452_v6, %v435_v44  ;;  %v510_v37 = vadd.f32 %v495_v2, %v435_v44  ;;  %v550_v27 = vadd.f32 %v535_v9, %v435_v44  ;;  %v590_v53 = vadd.f32 %v575_v11, %v435_v44  ;;  %v699_v2 = vpop.permute.xlu1 %698  ;;  %v739_v9 = vpop.permute.xlu2 %738 }
 0x1dd   :  { %v630_v56 = vadd.f32 %v615_v20, %v435_v44  ;;  %v670_v57 = vadd.f32 %v655_v10, %v435_v44  ;;  %v710_v58 = vadd.f32 %v695_v24, %v435_v44  ;;  %v750_v61 = vadd.f32 %v735_v21, %v435_v44 }
 0x1de   :  { %v478_v52 = vmax.f32 %v470_v30, 0.0  ;;  %v518_v62 = vmax.f32 %v510_v37, 0.0  ;;  %v558_v63 = vmax.f32 %v550_v27, 0.0  ;;  %v598_v0 = vmax.f32 %v590_v53, 0.0 }
 0x1df   :  { %v638_v33 = vmax.f32 %v630_v56, 0.0  ;;  %v678_v1 = vmax.f32 %v670_v57, 0.0  ;;  %v718_v59 = vmax.f32 %v710_v58, 0.0  ;;  %v758_v31 = vmax.f32 %v750_v61, 0.0  ;;  %v418_v25 = vpop.f32.mrf.mxu0 }
 0x1e0   :  { %v485_v26 = vpack.c.bf16 %v478_v52, %v477_v45  ;;  %v525_v28 = vpack.c.bf16 %v518_v62, %v517_v46  ;;  %v565_v29 = vpack.c.bf16 %v558_v63, %v557_v47  ;;  %v605_v6 = vpack.c.bf16 %v598_v0, %v597_v48  ;;  %v437_v46 = vpop.f32.mrf.mxu1 }
 0x1e1   :  { %v645_v11 = vpack.c.bf16 %v638_v33, %v637_v40  ;;  %v685_v20 = vpack.c.bf16 %v678_v1, %v677_v49  ;;  %v725_v10 = vpack.c.bf16 %v718_v59, %v717_v50  ;;  %v765_v24 = vpack.c.bf16 %v758_v31, %v757_v51 }
 0x1e2   :  { %489 = vst [vmem:[#allocation2] sm:$0xff] %v485_v26  ;;  %v471_v21 = vadd.f32 %v1937_v60, %v418_v25  ;;  %v511_v34 = vadd.f32 %v1945_v54, %v418_v25  ;;  %v551_v35 = vadd.f32 %v1963_v14, %v418_v25  ;;  %v591_v38 = vadd.f32 %v1947_v55, %v418_v25 }
 0x1e3   :  { %529 = vst [vmem:[#allocation2 + $0x8] sm:$0xff] %v525_v28  ;;  %v631_v36 = vadd.f32 %v1967_v17, %v418_v25  ;;  %v671_v41 = vadd.f32 %v1965_v16, %v418_v25  ;;  %v711_v44 = vadd.f32 %v699_v2, %v418_v25  ;;  %v751_v45 = vadd.f32 %v739_v9, %v418_v25 }
 0x1e4   :  { %569 = vst [vmem:[#allocation2 + $0x10] sm:$0xff] %v565_v29  ;;  %v479_v47 = vmax.f32 %v471_v21, 0.0  ;;  %v519_v48 = vmax.f32 %v511_v34, 0.0  ;;  %v559_v40 = vmax.f32 %v551_v35, 0.0  ;;  %v599_v49 = vmax.f32 %v591_v38, 0.0 }
 0x1e5   :  { %609 = vst [vmem:[#allocation2 + $0x18] sm:$0xff] %v605_v6  ;;  %v639_v50 = vmax.f32 %v631_v36, 0.0  ;;  %v679_v51 = vmax.f32 %v671_v41, 0.0  ;;  %v719_v30 = vmax.f32 %v711_v44, 0.0  ;;  %v759_v37 = vmax.f32 %v751_v45, 0.0 }
 0x1e6   :  { %649 = vst [vmem:[#allocation2 + $0x20] sm:$0xff] %v645_v11  ;;  %v472_v27 = vadd.f32 %v1937_v60, %v437_v46  ;;  %v512_v53 = vadd.f32 %v1945_v54, %v437_v46  ;;  %v552_v56 = vadd.f32 %v1963_v14, %v437_v46  ;;  %v592_v57 = vadd.f32 %v1947_v55, %v437_v46 }
 0x1e7   :  { %689 = vst [vmem:[#allocation2 + $0x28] sm:$0xff] %v685_v20  ;;  %v632_v58 = vadd.f32 %v1967_v17, %v437_v46  ;;  %v672_v61 = vadd.f32 %v1965_v16, %v437_v46  ;;  %v712_v52 = vadd.f32 %v699_v2, %v437_v46  ;;  %v752_v62 = vadd.f32 %v739_v9, %v437_v46  ;;  %v421_v14 = vpop.f32.mrf.mxu0 }
 0x1e8   :  { %729 = vst [vmem:[#allocation2 + $0x30] sm:$0xff] %v725_v10  ;;  %v480_v63 = vmax.f32 %v472_v27, 0.0  ;;  %v520_v0 = vmax.f32 %v512_v53, 0.0  ;;  %v560_v33 = vmax.f32 %v552_v56, 0.0  ;;  %v600_v1 = vmax.f32 %v592_v57, 0.0  ;;  %v440_v35 = vpop.f32.mrf.mxu1 }
 0x1e9   :  { %769 = vst [vmem:[#allocation2 + $0x38] sm:$0xff] %v765_v24  ;;  %v640_v60 = vmax.f32 %v632_v58, 0.0  ;;  %v680_v59 = vmax.f32 %v672_v61, 0.0  ;;  %v720_v54 = vmax.f32 %v712_v52, 0.0  ;;  %v760_v31 = vmax.f32 %v752_v62, 0.0 }
 0x1ea   :  { %v486_v25 = vpack.c.bf16 %v480_v63, %v479_v47  ;;  %v526_v55 = vpack.c.bf16 %v520_v0, %v519_v48  ;;  %v566_v26 = vpack.c.bf16 %v560_v33, %v559_v40  ;;  %v606_v28 = vpack.c.bf16 %v600_v1, %v599_v49  ;;  %v707_v33 = vpop.permute.xlu2 %706 }
 0x1eb   :  { %v646_v17 = vpack.c.bf16 %v640_v60, %v639_v50  ;;  %v686_v29 = vpack.c.bf16 %v680_v59, %v679_v51  ;;  %v726_v16 = vpack.c.bf16 %v720_v54, %v719_v30  ;;  %v766_v6 = vpack.c.bf16 %v760_v31, %v759_v37 }
 0x1ec   :  { %490 = vst [vmem:[#allocation2 + $0x40] sm:$0xff] %v486_v25  ;;  %v473_v2 = vadd.f32 %v1933_v39, %v421_v14  ;;  %v513_v9 = vadd.f32 %v1941_v18, %v421_v14  ;;  %v553_v11 = vadd.f32 %v1953_v7, %v421_v14  ;;  %v593_v20 = vadd.f32 %v1943_v4, %v421_v14 }
 0x1ed   :  { %530 = vst [vmem:[#allocation2 + $0x48] sm:$0xff] %v526_v55  ;;  %v633_v10 = vadd.f32 %v1969_v19, %v421_v14  ;;  %v673_v24 = vadd.f32 %v1955_v43, %v421_v14  ;;  %v713_v21 = vadd.f32 %v1975_v23, %v421_v14  ;;  %v753_v34 = vadd.f32 %v1973_v15, %v421_v14 }
 0x1ee   :  { %570 = vst [vmem:[#allocation2 + $0x50] sm:$0xff] %v566_v26  ;;  %v481_v38 = vmax.f32 %v473_v2, 0.0  ;;  %v521_v36 = vmax.f32 %v513_v9, 0.0  ;;  %v561_v41 = vmax.f32 %v553_v11, 0.0  ;;  %v601_v44 = vmax.f32 %v593_v20, 0.0 }
 0x1ef   :  { %610 = vst [vmem:[#allocation2 + $0x58] sm:$0xff] %v606_v28  ;;  %v641_v45 = vmax.f32 %v633_v10, 0.0  ;;  %v681_v46 = vmax.f32 %v673_v24, 0.0  ;;  %v721_v47 = vmax.f32 %v713_v21, 0.0  ;;  %v761_v48 = vmax.f32 %v753_v34, 0.0 }
 0x1f0   :  { %650 = vst [vmem:[#allocation2 + $0x60] sm:$0xff] %v646_v17  ;;  %v474_v40 = vadd.f32 %v1933_v39, %v440_v35  ;;  %v514_v49 = vadd.f32 %v1941_v18, %v440_v35  ;;  %v554_v50 = vadd.f32 %v1953_v7, %v440_v35  ;;  %v594_v51 = vadd.f32 %v1943_v4, %v440_v35  ;;  %v423_v4 = vpop.f32.mrf.mxu0  ;;  %v442_v25 = vpop.f32.mrf.mxu1 }
 0x1f1   :  { %690 = vst [vmem:[#allocation2 + $0x68] sm:$0xff] %v686_v29  ;;  %v634_v30 = vadd.f32 %v1969_v19, %v440_v35  ;;  %v674_v37 = vadd.f32 %v1955_v43, %v440_v35  ;;  %v714_v27 = vadd.f32 %v1975_v23, %v440_v35  ;;  %v754_v53 = vadd.f32 %v1973_v15, %v440_v35 }
 0x1f2   :  { %730 = vst [vmem:[#allocation2 + $0x70] sm:$0xff] %v726_v16  ;;  %v482_v56 = vmax.f32 %v474_v40, 0.0  ;;  %v522_v57 = vmax.f32 %v514_v49, 0.0  ;;  %v562_v58 = vmax.f32 %v554_v50, 0.0  ;;  %v602_v39 = vmax.f32 %v594_v51, 0.0 }
 0x1f3   :  { %770 = vst [vmem:[#allocation2 + $0x78] sm:$0xff] %v766_v6  ;;  %v642_v18 = vmax.f32 %v634_v30, 0.0  ;;  %v682_v61 = vmax.f32 %v674_v37, 0.0  ;;  %v722_v7 = vmax.f32 %v714_v27, 0.0  ;;  %v762_v52 = vmax.f32 %v754_v53, 0.0 }
 0x1f4   :  { %v487_v62 = vpack.c.bf16 %v482_v56, %v481_v38  ;;  %v527_v63 = vpack.c.bf16 %v522_v57, %v521_v36  ;;  %v567_v19 = vpack.c.bf16 %v562_v58, %v561_v41  ;;  %v607_v0 = vpack.c.bf16 %v602_v39, %v601_v44  ;;  %v1556_v39 = vld [vmem:[#allocation2 + $0x3c] sm:$0xf0] }
 0x1f5   :  { %v647_v43 = vpack.c.bf16 %v642_v18, %v641_v45  ;;  %v475_v15 = vadd.f32 %v1939_v3, %v423_v4  ;;  %v515_v23 = vadd.f32 %v1957_v8, %v423_v4  ;;  %v555_v1 = vadd.f32 %v1951_v5, %v423_v4  ;;  %v1398_v18 = vld [vmem:[#allocation2 + $0x40] sm:$0xf0] }
 0x1f6   :  { %491 = vst [vmem:[#allocation2 + $0x80] sm:$0xff] %v487_v62  ;;  %v595_v60 = vadd.f32 %v1949_v42, %v423_v4  ;;  %v687_v59 = vpack.c.bf16 %v682_v61, %v681_v46  ;;  %v727_v54 = vpack.c.bf16 %v722_v7, %v721_v47  ;;  %v767_v31 = vpack.c.bf16 %v762_v52, %v761_v48 }
 0x1f7   :  { %531 = vst [vmem:[#allocation2 + $0x88] sm:$0xff] %v527_v63  ;;  %v635_v14 = vadd.f32 %v1961_v13, %v423_v4  ;;  %v483_v55 = vmax.f32 %v475_v15, 0.0  ;;  %v675_v26 = vadd.f32 %v1959_v12, %v423_v4  ;;  %v715_v28 = vadd.f32 %v707_v33, %v423_v4  ;;  %v1414_v15 = vld [vmem:[#allocation2 + $0x50] sm:$0xf0] }
 0x1f8   :  { %571 = vst [vmem:[#allocation2 + $0x90] sm:$0xff] %v567_v19  ;;  %v755_v17 = vadd.f32 %v1971_v22, %v423_v4  ;;  %v523_v29 = vmax.f32 %v515_v23, 0.0  ;;  %v563_v16 = vmax.f32 %v555_v1, 0.0  ;;  %v603_v6 = vmax.f32 %v595_v60, 0.0  ;;  %v1396_v4 = vld [vmem:[#allocation2] sm:$0xf] }
 0x1f9   :  { %611 = vst [vmem:[#allocation2 + $0x98] sm:$0xff] %v607_v0  ;;  %v643_v2 = vmax.f32 %v635_v14, 0.0  ;;  %v476_v9 = vadd.f32 %v1939_v3, %v442_v25  ;;  %v516_v11 = vadd.f32 %v1957_v8, %v442_v25  ;;  %v556_v20 = vadd.f32 %v1951_v5, %v442_v25  ;;  %v1548_v19 = vld [vmem:[#allocation2 + $0x4] sm:$0xf]  ;;  %v1412_v14 = vld [vmem:[#allocation2 + $0x10] sm:$0xf] }
 0x1fa   :  { %651 = vst [vmem:[#allocation2 + $0xa0] sm:$0xff] %v647_v43  ;;  %v596_v10 = vadd.f32 %v1949_v42, %v442_v25  ;;  %v636_v24 = vadd.f32 %v1961_v13, %v442_v25  ;;  %v676_v21 = vadd.f32 %v1959_v12, %v442_v25  ;;  %v716_v34 = vadd.f32 %v707_v33, %v442_v25  ;;  %v1558_v33 = vld [vmem:[#allocation2 + $0x4c] sm:$0xf0] }
 0x1fb   :  { %691 = vst [vmem:[#allocation2 + $0xa8] sm:$0xff] %v687_v59  ;;  %v756_v35 = vadd.f32 %v1971_v22, %v442_v25  ;;  %v484_v38 = vmax.f32 %v476_v9, 0.0  ;;  %v524_v36 = vmax.f32 %v516_v11, 0.0  ;;  %v564_v41 = vmax.f32 %v556_v20, 0.0  ;;  %v1550_v25 = vld [vmem:[#allocation2 + $0x14] sm:$0xf] }
 0x1fc   :  { %731 = vst [vmem:[#allocation2 + $0xb0] sm:$0xff] %v727_v54  ;;  %v604_v44 = vmax.f32 %v596_v10, 0.0  ;;  %v683_v3 = vmax.f32 %v675_v26, 0.0  ;;  %v723_v8 = vmax.f32 %v715_v28, 0.0  ;;  %v644_v45 = vmax.f32 %v636_v24, 0.0 }
 0x1fd   :  { %771 = vst [vmem:[#allocation2 + $0xb8] sm:$0xff] %v767_v31  ;;  %v684_v5 = vmax.f32 %v676_v21, 0.0  ;;  %v488_v46 = vpack.c.bf16 %v484_v38, %v483_v55  ;;  %v528_v42 = vpack.c.bf16 %v524_v36, %v523_v29  ;;  %v568_v47 = vpack.c.bf16 %v564_v41, %v563_v16  ;;  %v1460_v30 = vld [vmem:[#allocation2 + $0x80] sm:$0xf]  ;;  %v1564_v37 = vld [vmem:[#allocation2 + $0x84] sm:$0xf] }
 0x1fe   :  { %v724_v48 = vmax.f32 %v716_v34, 0.0  ;;  %v763_v13 = vmax.f32 %v755_v17, 0.0  ;;  %v608_v40 = vpack.c.bf16 %v604_v44, %v603_v6  ;;  %v764_v12 = vmax.f32 %v756_v35, 0.0  ;;  %v1468_v23 = vld [vmem:[#allocation2 + $0x88] sm:$0xf] }
 0x1ff   :  { %492 = vst [vmem:[#allocation2 + $0xc0] sm:$0xff] %v488_v46  ;;  %v648_v49 = vpack.c.bf16 %v644_v45, %v643_v2  ;;  %v688_v22 = vpack.c.bf16 %v684_v5, %v683_v3  ;;  %v1476_v58 = vld [vmem:[#allocation2 + $0x90] sm:$0xf]  ;;  %v1566_v7 = vld [vmem:[#allocation2 + $0x94] sm:$0xf]  ;;  %v1397_v1 = vor.u32 %v1556_v39, %v1396_v4  ;;  %v1401_v60 = vor.u32 %v1548_v19, %v1398_v18 }
 0x200   :  { %532 = vst [vmem:[#allocation2 + $0xc8] sm:$0xff] %v528_v42  ;;  %v728_v50 = vpack.c.bf16 %v724_v48, %v723_v8  ;;  %v768_v51 = vpack.c.bf16 %v764_v12, %v763_v13  ;;  %v1565_v59 = vld [vmem:[#allocation2 + $0x8c] sm:$0xf]  ;;  %v1557_v28 = vld [vmem:[#allocation2 + $0x44] sm:$0xf0]  ;;  %v1413_v17 = vor.u32 %v1558_v33, %v1412_v14  ;;  %v1417_v29 = vor.u32 %v1550_v25, %v1414_v15 }
 0x201   :  { %572 = vst [vmem:[#allocation2 + $0xd0] sm:$0xff] %v568_v47  ;;  %v1492_v16 = vld [vmem:[#allocation2 + $0xa0] sm:$0xf]  ;;  %v1568_v6 = vld [vmem:[#allocation2 + $0xa4] sm:$0xf] }
 0x202   :  { %612 = vst [vmem:[#allocation2 + $0xd8] sm:$0xff] %v608_v40  ;;  %v1406_v2 = vld [vmem:[#allocation2 + $0x48] sm:$0xf0]  ;;  %v2022_v20 = vld [vmem:[%s2143_s9] sm:$0x3] }
 0x203   :  { %652 = vst [vmem:[#allocation2 + $0xe0] sm:$0xff] %v648_v49  ;;  %v1404_v10 = vld [vmem:[#allocation2 + $0x8] sm:$0xf]  ;;  %v1549_v24 = vld [vmem:[#allocation2 + $0xc] sm:$0xf] }
 0x204   :  { %692 = vst [vmem:[#allocation2 + $0xe8] sm:$0xff] %v688_v22  ;;  %v1560_v21 = vld [vmem:[#allocation2 + $0x5c] sm:$0xf0]  ;;  %v1430_v34 = vld [vmem:[#allocation2 + $0x60] sm:$0xf0]  ;;  %v1405_v35 = vor.u32 %v1557_v28, %v1404_v10  ;;  %v1409_v38 = vor.u32 %v1549_v24, %v1406_v2 }
 0x205   :  { %732 = vst [vmem:[#allocation2 + $0xf0] sm:$0xff] %v728_v50  ;;  %v1428_v36 = vld [vmem:[#allocation2 + $0x20] sm:$0xf]  ;;  %v1552_v3 = vld [vmem:[#allocation2 + $0x24] sm:$0xf] }
 0x206   :  { %772 = vst [vmem:[#allocation2 + $0xf8] sm:$0xff] %v768_v51  ;;  %v1572_v27 = vld [vmem:[#allocation2 + $0xbc] sm:$0xf0]  ;;  %v1462_v53 = vld [vmem:[#allocation2 + $0xc0] sm:$0xf0]  ;;  %v1429_v5 = vor.u32 %v1560_v21, %v1428_v36  ;;  %v1433_v46 = vor.u32 %v1552_v3, %v1430_v34 }
 0x207   :  { %v1461_v56 = vor.u32 %v1572_v27, %v1460_v30  ;;  %v1465_v57 = vor.u32 %v1564_v37, %v1462_v53  ;;  %v1573_v0 = vld [vmem:[#allocation2 + $0xc4] sm:$0xf0]  ;;  %v1470_v43 = vld [vmem:[#allocation2 + $0xc8] sm:$0xf0]  ;;  %v1484_v42 = vld [vmem:[#allocation2 + $0x98] sm:$0xf] }
 0x208   :  { %v1574_v61 = vld [vmem:[#allocation2 + $0xcc] sm:$0xf0]  ;;  %v1478_v52 = vld [vmem:[#allocation2 + $0xd0] sm:$0xf0]  ;;  %v1469_v55 = vor.u32 %v1573_v0, %v1468_v23  ;;  %v1473_v26 = vor.u32 %v1565_v59, %v1470_v43  ;;  %v1567_v47 = vld [vmem:[#allocation2 + $0x9c] sm:$0xf] }
 0x209   :  { %981 = vmatpush.bf16.msrb.mxu2 %v1461_v56  ;;  %994 = vmatpush.bf16.msrb.mxu3 %v1465_v57  ;;  %v1477_v62 = vor.u32 %v1574_v61, %v1476_v58  ;;  %v1481_v63 = vor.u32 %v1566_v7, %v1478_v52  ;;  %v1575_v41 = vld [vmem:[#allocation2 + $0xd4] sm:$0xf0]  ;;  %v1486_v44 = vld [vmem:[#allocation2 + $0xd8] sm:$0xf0]  ;;  %v1508_v40 = vld [vmem:[#allocation2 + $0xb0] sm:$0xf] }
 0x20a   :  { %v1576_v54 = vld [vmem:[#allocation2 + $0xdc] sm:$0xf0]  ;;  %v1494_v31 = vld [vmem:[#allocation2 + $0xe0] sm:$0xf0]  ;;  %v1485_v48 = vor.u32 %v1575_v41, %v1484_v42  ;;  %v1489_v13 = vor.u32 %v1567_v47, %v1486_v44  ;;  %v1570_v12 = vld [vmem:[#allocation2 + $0xb4] sm:$0xf] }
 0x20b   :  { %1033 = vmatpush.bf16.msra.mxu0 %v1477_v62  ;;  %1046 = vmatpush.bf16.msra.mxu1 %v1481_v63  ;;  %v1493_v9 = vor.u32 %v1576_v54, %v1492_v16  ;;  %v1497_v11 = vor.u32 %v1568_v6, %v1494_v31  ;;  %v1559_v50 = vld [vmem:[#allocation2 + $0x54] sm:$0xf0]  ;;  %v1422_v51 = vld [vmem:[#allocation2 + $0x58] sm:$0xf0]  ;;  %v1562_v30 = vld [vmem:[#allocation2 + $0x6c] sm:$0xf0] }
 0x20c   :  { %v1578_v8 = vld [vmem:[#allocation2 + $0xec] sm:$0xf0]  ;;  %v1510_v45 = vld [vmem:[#allocation2 + $0xf0] sm:$0xf0]  ;;  %v1420_v27 = vld [vmem:[#allocation2 + $0x18] sm:$0xf] }
 0x20d   :  { %982 = vmatpush.bf16.msrb.mxu2 %v1397_v1  ;;  %995 = vmatpush.bf16.msrb.mxu3 %v1401_v60  ;;  %v1509_v49 = vor.u32 %v1578_v8, %v1508_v40  ;;  %v1513_v22 = vor.u32 %v1570_v12, %v1510_v45  ;;  %v1446_v37 = vld [vmem:[#allocation2 + $0x70] sm:$0xf0]  ;;  %v1551_v53 = vld [vmem:[#allocation2 + $0x1c] sm:$0xf]  ;;  %v1421_v56 = vor.u32 %v1559_v50, %v1420_v27  ;;  %v1444_v58 = vld [vmem:[#allocation2 + $0x30] sm:$0xf] }
 0x20e   :  { %v1425_v57 = vor.u32 %v1551_v53, %v1422_v51  ;;  %v1554_v39 = vld [vmem:[#allocation2 + $0x34] sm:$0xf]  ;;  %v1445_v18 = vor.u32 %v1562_v30, %v1444_v58  ;;  %v1577_v7 = vld [vmem:[#allocation2 + $0xe4] sm:$0xf0]  ;;  %v1502_v52 = vld [vmem:[#allocation2 + $0xe8] sm:$0xf0] }
 0x20f   :  { %1034 = vmatpush.bf16.msra.mxu0 %v1413_v17  ;;  %1047 = vmatpush.bf16.msra.mxu1 %v1417_v29  ;;  %v1449_v61 = vor.u32 %v1554_v39, %v1446_v37  ;;  %v1500_v4 = vld [vmem:[#allocation2 + $0xa8] sm:$0xf]  ;;  %v1569_v62 = vld [vmem:[#allocation2 + $0xac] sm:$0xf]  ;;  %v806_v33 = vld [vmem:[%s2144_s10] sm:$0x7] }
 0x210   :  { %1522 = vmatmul.msk.bf16.vlgmr.msrb.gmra.mxu2 %vm196_vm0, %v2022_v20  ;;  %1523 = vmatmul.msk.bf16.vlgmr.msrb.gmra.mxu3 %vm196_vm0, %v2022_v20  ;;  %v1501_v63 = vor.u32 %v1577_v7, %v1500_v4  ;;  %v1505_v19 = vor.u32 %v1569_v62, %v1502_v52  ;;  %v1561_v0 = vld [vmem:[#allocation2 + $0x64] sm:$0xf0]  ;;  %v1438_v43 = vld [vmem:[#allocation2 + $0x68] sm:$0xf0]  ;;  %v1579_v59 = vld [vmem:[#allocation2 + $0xf4] sm:$0xf0] }
 0x211   :  { %1007 = vmatpush.bf16.msra.mxu2 %v1469_v55  ;;  %1020 = vmatpush.bf16.msra.mxu3 %v1473_v26  ;;  %v1436_v15 = vld [vmem:[#allocation2 + $0x28] sm:$0xf]  ;;  %v1553_v23 = vld [vmem:[#allocation2 + $0x2c] sm:$0xf]  ;;  %v1518_v54 = vld [vmem:[#allocation2 + $0xf8] sm:$0xf0] }
 0x212   :  { %1526 = vmatmul.msk.bf16.vlgmr.msra.gmra.mxu0 %vm196_vm0, %v2022_v20  ;;  %1527 = vmatmul.msk.bf16.vlgmr.msra.gmra.mxu1 %vm196_vm0, %v2022_v20  ;;  %v1437_v1 = vor.u32 %v1561_v0, %v1436_v15  ;;  %v1441_v60 = vor.u32 %v1553_v23, %v1438_v43  ;;  %v1516_v31 = vld [vmem:[#allocation2 + $0xb8] sm:$0xf]  ;;  %v1571_v14 = vld [vmem:[#allocation2 + $0xbc] sm:$0xf]  ;;  %1334 = dma.vmem_to_hbm [thread:$0]  %s1327_s23, 4096, %s1329_s21, [#allocation3], %s1690_s24, %s1690_s24, %s1691_s25  }
 0x213   :  { %1085 = vmatpush.bf16.msrb.mxu0 %v1493_v9  ;;  %1098 = vmatpush.bf16.msrb.mxu1 %v1497_v11  ;;  %v1517_v25 = vor.u32 %v1579_v59, %v1516_v31  ;;  %v1521_v55 = vor.u32 %v1571_v14, %v1518_v54  ;;  %v1563_v26 = vld [vmem:[#allocation2 + $0x74] sm:$0xf0]  ;;  %v1454_v28 = vld [vmem:[#allocation2 + $0x78] sm:$0xf0] }
 0x214   :  { %809 = vperm.xlu2 %1621, %v806_v33   ;;  %v1452_v17 = vld [vmem:[#allocation2 + $0x38] sm:$0xf]  ;;  %v1555_v29 = vld [vmem:[#allocation2 + $0x3c] sm:$0xf] }
 0x215   :  { %1008 = vmatpush.bf16.msra.mxu2 %v1405_v35  ;;  %1021 = vmatpush.bf16.msra.mxu3 %v1409_v38  ;;  %v1453_v16 = vor.u32 %v1563_v26, %v1452_v17  ;;  %v1457_v6 = vor.u32 %v1555_v29, %v1454_v28  ;;  %v1200_v2 = vld.sshfl [vmem:[#allocation1] sm:$0xff pattern:$0x75316420]  ;;  %v1201_v9 = vld.sshfl [vmem:[#allocation1 + $0x8] sm:$0xff pattern:$0x75316420] }
 0x216   :  { %1204 = vst [vmem:[#allocation1] ss:$2 sm:$0xff] %v1859_v32 }
 0x217   :  { %1086 = vmatpush.bf16.msrb.mxu0 %v1429_v5  ;;  %1099 = vmatpush.bf16.msrb.mxu1 %v1433_v46 }
 0x219   :  { %1059 = vmatpush.bf16.msrb.mxu2 %v1485_v48  ;;  %1072 = vmatpush.bf16.msrb.mxu3 %v1489_v13 }
 0x21b   :  { %1137 = vmatpush.bf16.msra.mxu0 %v1509_v49  ;;  %1150 = vmatpush.bf16.msra.mxu1 %v1513_v22 }
 0x21d   :  { %1060 = vmatpush.bf16.msrb.mxu2 %v1421_v56  ;;  %1073 = vmatpush.bf16.msrb.mxu3 %v1425_v57  ;;  %v1206_v11 = vld.sshfl [vmem:[#allocation1 + $0x8] sm:$0xff pattern:$0x75316420]  ;;  %v2065_v24 = vld.sshfl [vmem:[#allocation1] sm:$0xff pattern:$0x75316420] }
 0x21e   :  { %1209 = vst [vmem:[#allocation1] ss:$2 sm:$0xff] %v1859_v32 }
 0x21f   :  { %1138 = vmatpush.bf16.msra.mxu0 %v1445_v18  ;;  %1151 = vmatpush.bf16.msra.mxu1 %v1449_v61 }
 0x220   :  { %1524 = vmatmul.msk.bf16.vlgmr.msra.gmra.mxu2 %vm196_vm0, %v2022_v20  ;;  %1525 = vmatmul.msk.bf16.vlgmr.msra.gmra.mxu3 %vm196_vm0, %v2022_v20 }
 0x221   :  { %1111 = vmatpush.bf16.msra.mxu2 %v1501_v63  ;;  %1124 = vmatpush.bf16.msra.mxu3 %v1505_v19 }
 0x222   :  { %1531 = vmatmul.msk.bf16.vlgmr.msrb.gmra.mxu1 %vm196_vm0, %v2022_v20  ;;  %1530 = vmatmul.msk.bf16.vlgmr.msrb.gmra.mxu0 %vm196_vm0, %v2022_v20 }
 0x225   :  { %1112 = vmatpush.bf16.msra.mxu2 %v1437_v1  ;;  %1125 = vmatpush.bf16.msra.mxu3 %v1441_v60  ;;  %v1210_v41 = vld.sshfl [vmem:[#allocation1] sm:$0xff pattern:$0x75316420]  ;;  %v1211_v44 = vld.sshfl [vmem:[#allocation1 + $0x8] sm:$0xff pattern:$0x75316420] }
 0x226   :  { %1214 = vst [vmem:[#allocation1] ss:$2 sm:$0xff] %v1859_v32 }
 0x22d   :  { %v2072_v12 = vld.sshfl [vmem:[#allocation1 + $0x8] sm:$0xff pattern:$0x75316420]  ;;  %v2074_v22 = vld.sshfl [vmem:[#allocation1] sm:$0xff pattern:$0x75316420] }
 0x22e   :  { %1219 = vst [vmem:[#allocation1] ss:$2 sm:$0xff] %v1859_v32 }
 0x230   :  { %1528 = vmatmul.msk.bf16.vlgmr.msrb.gmra.mxu2 %vm196_vm0, %v2022_v20  ;;  %1529 = vmatmul.msk.bf16.vlgmr.msrb.gmra.mxu3 %vm196_vm0, %v2022_v20 }
 0x231   :  { %1163 = vmatpush.bf16.msrb.mxu2 %v1517_v25  ;;  %1176 = vmatpush.bf16.msrb.mxu3 %v1521_v55 }
 0x232   :  { %1535 = vmatmul.msk.bf16.vlgmr.msra.gmra.mxu1 %vm196_vm0, %v2022_v20  ;;  %1534 = vmatmul.msk.bf16.vlgmr.msra.gmra.mxu0 %vm196_vm0, %v2022_v20 }
 0x235   :  { %1164 = vmatpush.bf16.msrb.mxu2 %v1453_v16  ;;  %1177 = vmatpush.bf16.msrb.mxu3 %v1457_v6  ;;  %v1220_v61 = vld.sshfl [vmem:[#allocation1] sm:$0xff pattern:$0x75316420]  ;;  %v1221_v52 = vld.sshfl [vmem:[#allocation1 + $0x8] sm:$0xff pattern:$0x75316420] }
 0x236   :  { %1224 = vst [vmem:[#allocation1] ss:$2 sm:$0xff] %v1859_v32 }
 0x23d   :  { %v2091_v55 = vld.sshfl [vmem:[#allocation1 + $0x8] sm:$0xff pattern:$0x75316420]  ;;  %v2094_v17 = vld.sshfl [vmem:[#allocation1] sm:$0xff pattern:$0x75316420] }
 0x23e   :  { %1229 = vst [vmem:[#allocation1] ss:$2 sm:$0xff] %v1859_v32 }
 0x240   :  { %1533 = vmatmul.msk.bf16.vlgmr.msra.gmra.mxu3 %vm196_vm0, %v2022_v20  ;;  %1532 = vmatmul.msk.bf16.vlgmr.msra.gmra.mxu2 %vm196_vm0, %v2022_v20 }
 0x250   :  { %1537 = vmatmul.msk.bf16.vlgmr.msrb.gmra.mxu3 %vm196_vm0, %v2022_v20  ;;  %1536 = vmatmul.msk.bf16.vlgmr.msrb.gmra.mxu2 %vm196_vm0, %v2022_v20 }
 0x26e   :  { %v2063_v10 = vpop.permute.xlu2 %809 }
 0x28f   :  { %v1049_v38 = vpop.f32.mrf.mxu1  ;;  %v1036_v49 = vpop.f32.mrf.mxu0 }
 0x290   :  { %v1050_v36 = vadd.f32 %v1049_v38, %v2063_v10  ;;  %v1037_v51 = vadd.f32 %v1036_v49, %v2063_v10  ;;  %v1230_v38 = vld.sshfl [vmem:[#allocation1] sm:$0xff pattern:$0x75316420] }
 0x293   :  { %v997_v20 = vpop.f32.mrf.mxu3  ;;  %v984_v21 = vpop.f32.mrf.mxu2 }
 0x294   :  { %v985_v34 = vadd.f32 %v984_v21, %v2063_v10  ;;  %v998_v35 = vadd.f32 %v997_v20, %v2063_v10 }
 0x296   :  { %1623 = vtanh.f32 %v985_v34 }
 0x297   :  { %1625 = vtanh.f32 %v998_v35  ;;  %v1051_v5 = vpop.f32.mrf.mxu1  ;;  %v1038_v7 = vpop.f32.mrf.mxu0 }
 0x298   :  { %1627 = vtanh.f32 %v1050_v36  ;;  %v1231_v36 = vld.sshfl [vmem:[#allocation1 + $0x8] sm:$0xff pattern:$0x75316420] }
 0x299   :  { %1629 = vtanh.f32 %v1037_v51  ;;  %1234 = vst [vmem:[#allocation1] ss:$2 sm:$0xff] %v1859_v32 }
 0x29b   :  { %v999_v3 = vpop.f32.mrf.mxu3  ;;  %v986_v8 = vpop.f32.mrf.mxu2 }
 0x29c   :  { %v1624_v45 = vpop.eup %1623 }
 0x29d   :  { %v1626_v46 = vpop.eup %1625  ;;  %v1239_v42 = vmul.f32 0.2, %v1624_v45 }
 0x29e   :  { %v1240_v47 = vmul.f32 0.2, %v1626_v46  ;;  %v1628_v48 = vpop.eup %1627 }
 0x29f   :  { %v1255_v13 = vadd.f32 %v1239_v42, %v1200_v2  ;;  %v1244_v27 = vmul.f32 0.2, %v1628_v48  ;;  %v1101_v58 = vpop.f32.mrf.mxu1  ;;  %v1630_v4 = vpop.eup %1629 }
 0x2a0   :  { %v1256_v40 = vadd.f32 %v1240_v47, %v1201_v9  ;;  %v1102_v39 = vadd.f32 %v1101_v58, %v2063_v10  ;;  %v1243_v0 = vmul.f32 0.2, %v1630_v4  ;;  %v1088_v26 = vpop.f32.mrf.mxu0 }
 0x2a1   :  { %v1260_v18 = vadd.f32 %v1244_v27, %v1211_v44  ;;  %v1089_v28 = vadd.f32 %v1088_v26, %v2063_v10  ;;  %v1236_v26 = vld.sshfl [vmem:[#allocation1 + $0x8] sm:$0xff pattern:$0x75316420] }
 0x2a2   :  { %v1287_v50 = vrot.slane %v1256_v40, 4  ;;  %v1259_v1 = vadd.f32 %v1243_v0, %v1210_v41 }
 0x2a3   :  { %v1023_v30 = vpop.f32.mrf.mxu3  ;;  %v1010_v37 = vpop.f32.mrf.mxu2  ;;  %v1289_v19 = vrot.slane %v1260_v18, 4 }
 0x2a4   :  { %v1024_v53 = vadd.f32 %v1023_v30, %v2063_v10  ;;  %v1011_v56 = vadd.f32 %v1010_v37, %v2063_v10  ;;  %v1296_v57 = vsel %vm1295_vm1, %v1255_v13, %v1287_v50 }
 0x2a5   :  { %1312 = vst [vmem:[%s2145_s11] sm:$0x77] %v1296_v57  ;;  %v1298_v54 = vsel %vm1295_vm1, %v1259_v1, %v1289_v19 }
 0x2a6   :  { %1631 = vtanh.f32 %v1024_v53  ;;  %1314 = vst [vmem:[%s2145_s11 + $0x10] sm:$0x77] %v1298_v54 }
 0x2a7   :  { %1633 = vtanh.f32 %v1011_v56  ;;  %v1103_v33 = vpop.f32.mrf.mxu1 }
 0x2a8   :  { %1635 = vtanh.f32 %v1102_v39  ;;  %v1090_v34 = vpop.f32.mrf.mxu0 }
 0x2a9   :  { %1637 = vtanh.f32 %v1089_v28 }
 0x2ab   :  { %v1025_v62 = vpop.f32.mrf.mxu3  ;;  %v1012_v63 = vpop.f32.mrf.mxu2 }
 0x2ac   :  { %v1632_v43 = vpop.eup %1631 }
 0x2ad   :  { %v1634_v15 = vpop.eup %1633  ;;  %v1242_v23 = vmul.f32 0.2, %v1632_v43 }
 0x2ae   :  { %v1241_v60 = vmul.f32 0.2, %v1634_v15  ;;  %v1636_v31 = vpop.eup %1635 }
 0x2af   :  { %v1258_v59 = vadd.f32 %v1242_v23, %v1206_v11  ;;  %v1248_v2 = vmul.f32 0.2, %v1636_v31  ;;  %v1638_v35 = vpop.eup %1637 }
 0x2b0   :  { %v1257_v14 = vadd.f32 %v1241_v60, %v2065_v24  ;;  %v1153_v24 = vpop.f32.mrf.mxu1  ;;  %v1247_v8 = vmul.f32 0.2, %v1638_v35  ;;  %v1140_v30 = vpop.f32.mrf.mxu0 }
 0x2b1   :  { %v1288_v25 = vrot.slane %v1258_v59, 4  ;;  %v1154_v20 = vadd.f32 %v1153_v24, %v2063_v10  ;;  %v1264_v21 = vadd.f32 %v1248_v2, %v1221_v52  ;;  %v1141_v32 = vadd.f32 %v1140_v30, %v2063_v10 }
 0x2b2   :  { %v1263_v47 = vadd.f32 %v1247_v8, %v1220_v61 }
 0x2b3   :  { %v1297_v29 = vsel %vm1295_vm1, %v1257_v14, %v1288_v25  ;;  %v1075_v16 = vpop.f32.mrf.mxu3  ;;  %v1062_v6 = vpop.f32.mrf.mxu2  ;;  %v1291_v3 = vrot.slane %v1264_v21, 4 }
 0x2b4   :  { %1313 = vst [vmem:[%s2145_s11 + $0x8] sm:$0x77] %v1297_v29  ;;  %v1076_v9 = vadd.f32 %v1075_v16, %v2063_v10  ;;  %v1063_v11 = vadd.f32 %v1062_v6, %v2063_v10  ;;  %v1235_v29 = vld.sshfl [vmem:[#allocation1] sm:$0xff pattern:$0x75316420] }
 0x2b5   :  { %v1300_v40 = vsel %vm1295_vm1, %v1263_v47, %v1291_v3 }
 0x2b6   :  { %1639 = vtanh.f32 %v1076_v9  ;;  %1316 = vst [vmem:[%s2145_s11 + $0x20] sm:$0x77] %v1300_v40 }
 0x2b7   :  { %1641 = vtanh.f32 %v1063_v11 }
 0x2b8   :  { %1643 = vtanh.f32 %v1154_v20  ;;  %v1155_v5 = vpop.f32.mrf.mxu1  ;;  %v1142_v58 = vpop.f32.mrf.mxu0 }
 0x2b9   :  { %1645 = vtanh.f32 %v1141_v32 }
 0x2bb   :  { %v1077_v41 = vpop.f32.mrf.mxu3  ;;  %v1064_v44 = vpop.f32.mrf.mxu2 }
 0x2bc   :  { %v1640_v45 = vpop.eup %1639 }
 0x2bd   :  { %v1642_v46 = vpop.eup %1641  ;;  %v1246_v42 = vmul.f32 0.2, %v1640_v45 }
 0x2be   :  { %v1245_v48 = vmul.f32 0.2, %v1642_v46  ;;  %v1644_v49 = vpop.eup %1643 }
 0x2bf   :  { %v1262_v13 = vadd.f32 %v1246_v42, %v2072_v12  ;;  %v1252_v56 = vmul.f32 0.2, %v1644_v49  ;;  %v1646_v39 = vpop.eup %1645 }
 0x2c0   :  { %v1261_v50 = vadd.f32 %v1245_v48, %v2074_v22  ;;  %v1251_v52 = vmul.f32 0.2, %v1646_v39 }
 0x2c1   :  { %v1290_v51 = vrot.slane %v1262_v13, 4  ;;  %v1268_v57 = vadd.f32 %v1252_v56, %v1231_v36 }
 0x2c2   :  { %v1267_v19 = vadd.f32 %v1251_v52, %v1230_v38 }
 0x2c3   :  { %v1299_v37 = vsel %vm1295_vm1, %v1261_v50, %v1290_v51  ;;  %v1127_v27 = vpop.f32.mrf.mxu3  ;;  %v1114_v53 = vpop.f32.mrf.mxu2  ;;  %v1293_v7 = vrot.slane %v1268_v57, 4 }
 0x2c4   :  { %1315 = vst [vmem:[%s2145_s11 + $0x18] sm:$0x77] %v1299_v37  ;;  %v1128_v12 = vadd.f32 %v1127_v27, %v2063_v10  ;;  %v1115_v22 = vadd.f32 %v1114_v53, %v2063_v10 }
 0x2c5   :  { %v1302_v33 = vsel %vm1295_vm1, %v1267_v19, %v1293_v7 }
 0x2c6   :  { %1647 = vtanh.f32 %v1128_v12  ;;  %1318 = vst [vmem:[%s2145_s11 + $0x30] sm:$0x77] %v1302_v33 }
 0x2c7   :  { %1649 = vtanh.f32 %v1115_v22 }
 0x2cb   :  { %v1129_v18 = vpop.f32.mrf.mxu3  ;;  %v1116_v61 = vpop.f32.mrf.mxu2 }
 0x2cc   :  { %v1648_v4 = vpop.eup %1647 }
 0x2cd   :  { %v1650_v62 = vpop.eup %1649  ;;  %v1250_v63 = vmul.f32 0.2, %v1648_v4 }
 0x2ce   :  { %v1249_v0 = vmul.f32 0.2, %v1650_v62 }
 0x2cf   :  { %v1266_v43 = vadd.f32 %v1250_v63, %v2091_v55 }
 0x2d0   :  { %v1265_v15 = vadd.f32 %v1249_v0, %v2094_v17 }
 0x2d1   :  { %v1292_v23 = vrot.slane %v1266_v43, 4 }
 0x2d3   :  { %v1301_v1 = vsel %vm1295_vm1, %v1265_v15, %v1292_v23  ;;  %v1179_v60 = vpop.f32.mrf.mxu3  ;;  %v1166_v59 = vpop.f32.mrf.mxu2 }
 0x2d4   :  { %1317 = vst [vmem:[%s2145_s11 + $0x28] sm:$0x77] %v1301_v1  ;;  %v1180_v54 = vadd.f32 %v1179_v60, %v2063_v10  ;;  %v1167_v31 = vadd.f32 %v1166_v59, %v2063_v10 }
 0x2d6   :  { %1651 = vtanh.f32 %v1180_v54 }
 0x2d7   :  { %1653 = vtanh.f32 %v1167_v31 }
 0x2db   :  { %v1181_v14 = vpop.f32.mrf.mxu3  ;;  %v1168_v25 = vpop.f32.mrf.mxu2 }
 0x2dc   :  { %v1652_v55 = vpop.eup %1651 }
 0x2dd   :  { %v1654_v28 = vpop.eup %1653  ;;  %v1254_v17 = vmul.f32 0.2, %v1652_v55 }
 0x2de   :  { %v1253_v16 = vmul.f32 0.2, %v1654_v28 }
 0x2df   :  { %v1270_v6 = vadd.f32 %v1254_v17, %v1236_v26 }
 0x2e0   :  { %v1269_v9 = vadd.f32 %v1253_v16, %v1235_v29 }
 0x2e1   :  { %v1294_v2 = vrot.slane %v1270_v6, 4 }
 0x2e3   :  { %v1303_v11 = vsel %vm1295_vm1, %v1269_v9, %v1294_v2 }
 0x2e4   :  { %1319 = vst [vmem:[%s2145_s11 + $0x38] sm:$0x77] %v1303_v11 }
 0x2e5   :  { %1679 = dma.done.wait [#allocation3], 4096  }
 0x2e6   :  { %1680 = vsyncadd [#allocation3], 4294963200 }
 0x2e7   :  { %1341 = vsyncpa [#allocation3], 1 }

</bundles_post_ra>
